<compile_context>
chip_gen: v5e
topology: v5e:2x2
jax: 0.10.0
libtpu: 0.0.40
codegen_flags: <defaults>
</compile_context>

<pallas_src>
import functools

import jax
import jax.numpy as jnp
import numpy as np
from jax import lax
from jax.experimental import pallas as pl
from jax.experimental.pallas import tpu as pltpu


def _encoder_kernel(x_ref, w1_ref, b1_ref, w2_ref, b2_ref, out_ref, *, H, W, C1, C2):
    """One block of Nb batch elements per grid step.

    x_ref  : (Nb, H, C2*W)     VMEM  -- input pre-replicated across the C2 lane blocks
    w1_ref : (C1*9,)           SMEM  -- conv1 weights, index = c1*9 + dh*3 + dw
    b1_ref : (C1,)             SMEM
    w2_ref : (9, C1, 1, C2*W)  VMEM  -- conv2 weights, lane-blocked by output chan:
                                        w2_ref[dh*3+dw, c1, 0, c2*W + w] == w2[c2,c1,dh,dw]
    b2_ref : (1, C2*W)         VMEM  -- conv2 bias, lane-blocked by output channel
    out_ref: (Nb, H, C2*W)     VMEM  -- final (N, H, C2*W) layout, lane-dense
    """
    L = C2 * W
    f32 = jnp.float32

    # ---- hoisted constants (masks for the zero-padded shifts) -----------------
    lane_w = lax.broadcasted_iota(jnp.int32, (1, 1, L), 2) % W
    not_last = lane_w < (W - 1)     # lanes whose (w + 1) stays inside the block
    not_first = lane_w > 0          # lanes whose (w - 1) stays inside the block
    row_h = lax.broadcasted_iota(jnp.int32, (1, H, 1), 1)
    not_bottom = row_h < (H - 1)    # rows whose (h + 1) stays inside [0, H)
    not_top = row_h > 0             # rows whose (h - 1) stays inside [0, H)
    zero = jnp.zeros((), f32)

    # Hoisted SMEM scalar reads: FMA loops below are pure vreg x (splatted) sreg.
    w1_s = [w1_ref[i] for i in range(C1 * 9)]
    b1_s = [b1_ref[c] for c in range(C1)]

    def shift(a, oh, ow):
        """a[n, h, c2*W + w] -> value at (h+oh, w+ow); zero outside [0,H)x[0,W).

        Shifts go through the XLU (pltpu.roll) plus a hoisted-mask select; width
        shifts never leak across the W-wide lane blocks, which reproduces the
        zero-padding semantics of both 3x3 convolutions.
        """
        if oh == 1:
            a = jnp.where(not_bottom, pltpu.roll(a, shift=H - 1, axis=1), zero)
        elif oh == -1:
            a = jnp.where(not_top, pltpu.roll(a, shift=1, axis=1), zero)
        if ow == 1:
            a = jnp.where(not_last, pltpu.roll(a, shift=L - 1, axis=2), zero)
        elif ow == -1:
            a = jnp.where(not_first, pltpu.roll(a, shift=1, axis=2), zero)
        return a

    xr = x_ref[...]                                         # (Nb, H, C2*W)

    # ---- conv1 (1 -> C1) + bias + ReLU: stream the 9 spatial taps --------------
    # One shifted slab is live at a time; it is accumulated into all C1 channel
    # accumulators and discarded before the next tap (no 9-tap list, no spills).
    # TODO(synk): nn.Dropout after this ReLU is identity here (inference semantics).
    acc1 = None
    k = 0
    for dh in range(3):
        for dw in range(3):
            tap = shift(xr, dh - 1, dw - 1)
            if acc1 is None:
                acc1 = [tap * w1_s[c1 * 9 + k] for c1 in range(C1)]
            else:
                acc1 = [acc1[c1] + tap * w1_s[c1 * 9 + k] for c1 in range(C1)]
            k += 1
    h1 = [jnp.maximum(acc1[c1] + b1_s[c1], 0.0) for c1 in range(C1)]
    del acc1, xr

    # ---- conv2 (C1 -> C2) + bias + ReLU, accumulated directly in (H, C2*W) -----
    # shift() commutes with the block-constant weight rows, so each tap is C1
    # full-width FMAs followed by a single shift (9 taps total, streamed).
    acc2 = None
    k = 0
    for dh in range(3):
        for dw in range(3):
            mixed = h1[0] * w2_ref[k, 0]
            for c1 in range(1, C1):
                mixed = mixed + h1[c1] * w2_ref[k, c1]
            tap = shift(mixed, dh - 1, dw - 1)
            acc2 = tap if acc2 is None else acc2 + tap
            k += 1
    out_ref[...] = jnp.maximum(acc2 + b2_ref[...], 0.0)


def encoder_cnn_forward(x, w1, b1, w2, b2, *, block_n=4):
    """x: (N, H, W); w1: (C1,1,3,3); w2: (C2,C1,3,3). Returns (N, H, C2*W)."""
    N, H, W = x.shape
    C1 = w1.shape[0]
    C2 = w2.shape[0]
    L = C2 * W
    # NOTE: if a config ever makes L not a multiple of 128, pad L up in this wrapper
    # (the kernel stays numerically correct either way, only the store path degrades).

    # Keep >= 2 grid steps whenever N >= 2 so the "parallel" batch axis can be
    # sharded across v7x's two TensorCores (no effect on v5e/v6e).
    nb = max(1, min(block_n, -(-N // 2)))
    n_blocks = -(-N // nb)
    n_pad = n_blocks * nb

    xf = x.astype(jnp.float32)
    if n_pad != N:
        xf = jnp.pad(xf, ((0, n_pad - N), (0, 0), (0, 0)))

    # Pre-replicate the single input plane across the C2 lane blocks (HBM is tiny,
    # the DMA becomes a full 128-lane transfer, no in-kernel lane concat).
    x_rep = jnp.tile(xf, (1, 1, C2))                        # (n_pad, H, C2*W)

    # conv1 weights/bias as SMEM scalars (hoisted reads inside the kernel).
    w1_flat = w1.astype(jnp.float32).reshape(-1)            # index = c1*9 + dh*3 + dw
    b1f = b1.astype(jnp.float32)

    # conv2 weights/bias pre-broadcast along the lane axis, blocked by output channel.
    w2t = jnp.transpose(w2.astype(jnp.float32), (2, 3, 1, 0)).reshape(9, C1, C2)
    w2row = jnp.repeat(w2t, W, axis=-1).reshape(9, C1, 1, L)  # [k, c1, 0, c2*W + w]
    b2row = jnp.repeat(b2.astype(jnp.float32), W).reshape(1, L)

    kernel = functools.partial(_encoder_kernel, H=H, W=W, C1=C1, C2=C2)

    out = pl.pallas_call(
        kernel,
        out_shape=jax.ShapeDtypeStruct((n_pad, H, L), jnp.float32),
        grid_spec=pltpu.PrefetchScalarGridSpec(
            num_scalar_prefetch=0,
            grid=(n_blocks,),
            in_specs=[
                pl.BlockSpec((nb, H, L), lambda n: (n, 0, 0)),
                pl.BlockSpec(memory_space=pltpu.MemorySpace.SMEM),
                pl.BlockSpec(memory_space=pltpu.MemorySpace.SMEM),
                pl.BlockSpec((9, C1, 1, L), lambda n: (0, 0, 0, 0)),
                pl.BlockSpec((1, L), lambda n: (0, 0)),
            ],
            out_specs=pl.BlockSpec((nb, H, L), lambda n: (n, 0, 0)),
        ),
        compiler_params=pltpu.CompilerParams(dimension_semantics=("parallel",)),
    )(x_rep, w1_flat, b1f, w2row, b2row)

    return out[:N] if n_pad != N else out


def _reference_forward(x, w1, b1, w2, b2):
    """Pure-JAX reference mirroring the PyTorch module (eval-mode dropout)."""
    x4 = x[:, None].astype(jnp.float32)  # (N, 1, H, W)
    dn = ("NCHW", "OIHW", "NCHW")
    h1 = lax.conv_general_dilated(x4, w1, (1, 1), ((1, 1), (1, 1)),
                                  dimension_numbers=dn)
    h1 = jax.nn.relu(h1 + b1[None, :, None, None])
    h2 = lax.conv_general_dilated(h1, w2, (1, 1), ((1, 1), (1, 1)),
                                  dimension_numbers=dn)
    h2 = jax.nn.relu(h2 + b2[None, :, None, None])
    h2 = jnp.transpose(h2, (0, 2, 1, 3))          # (N, H, C2, W)
    return h2.reshape(h2.shape[0], h2.shape[1], -1)


if __name__ == "__main__":
    # config (kernel_size=3, padding=1 => ZeroPad2d layers are no-ops)
    N, H, W = 2, 16, 16          # batch, target_padding_length, conv_l1_in_width
    C1, C2 = 4, 8                # conv_l1_out_channel, conv_l2_out_channel

    key = jax.random.PRNGKey(0)
    kx, k1, k2, k3, k4 = jax.random.split(key, 5)
    x = jax.random.normal(kx, (N, H, W), dtype=jnp.float32)
    w1 = jax.random.normal(k1, (C1, 1, 3, 3), dtype=jnp.float32) * 0.3
    b1 = jax.random.normal(k2, (C1,), dtype=jnp.float32) * 0.1
    w2 = jax.random.normal(k3, (C2, C1, 3, 3), dtype=jnp.float32) * 0.1
    b2 = jax.random.normal(k4, (C2,), dtype=jnp.float32) * 0.1

    out = jax.block_until_ready(encoder_cnn_forward(x, w1, b1, w2, b2))
    ref = jax.block_until_ready(_reference_forward(x, w1, b1, w2, b2))

    assert out.shape == (N, H, C2 * W), out.shape
    np.testing.assert_allclose(np.asarray(out), np.asarray(ref), rtol=1e-4, atol=1e-4)
    print("KERNEL_OK")
</pallas_src>

<mosaic_0001>
module attributes {stable_mosaic.version = 11 : i64} {
  func.func @_encoder_kernel(%arg0: i32, %arg1: memref<1x16x128xf32, #tpu.memory_space<vmem>>, %arg2: memref<36xf32, #tpu.memory_space<smem>>, %arg3: memref<4xf32, #tpu.memory_space<smem>>, %arg4: memref<9x4x1x128xf32, #tpu.memory_space<vmem>>, %arg5: memref<1x128xf32, #tpu.memory_space<vmem>>, %arg6: memref<1x16x128xf32, #tpu.memory_space<vmem>>) attributes {dimension_semantics = [#tpu.dimension_semantics<parallel>], iteration_bounds = array<i64: 2>, scalar_prefetch = 0 : i64, scratch_operands = 0 : i64, tpu.core_type = #tpu.core_type<tc>, window_params = [{transform_indices = @transform_0, window_bounds = array<i64: 1, 16, 128>}, {transform_indices = @transform_1, window_bounds = array<i64: 36>}, {transform_indices = @transform_2, window_bounds = array<i64: 4>}, {pipeline_mode = #tpu.pipeline_mode<synchronous>, transform_indices = @transform_3, window_bounds = array<i64: 9, 4, 1, 128>}, {pipeline_mode = #tpu.pipeline_mode<synchronous>, transform_indices = @transform_4, window_bounds = array<i64: 1, 128>}, {transform_indices = @transform_5, window_bounds = array<i64: 1, 16, 128>}]} {
    %0 = tpu.iota {dimensions = array<i32: 2>} : vector<1x1x128xi32>
    %c16_i32 = arith.constant 16 : i32
    %c0_i32 = arith.constant 0 : i32
    %1 = arith.cmpi eq, %c16_i32, %c0_i32 : i32
    %c1_i32 = arith.constant 1 : i32
    %2 = arith.select %1, %c1_i32, %c16_i32 : i32
    %3 = vector.broadcast %2 : i32 to vector<1x1x128xi32>
    %4 = arith.remsi %0, %3 : vector<1x1x128xi32>
    %c0_i32_0 = arith.constant 0 : i32
    %5 = vector.broadcast %c0_i32_0 : i32 to vector<1x1x128xi32>
    %6 = arith.cmpi ne, %4, %5 : vector<1x1x128xi32>
    %c0_i32_1 = arith.constant 0 : i32
    %7 = vector.broadcast %c0_i32_1 : i32 to vector<1x1x128xi32>
    %8 = arith.cmpi slt, %4, %7 : vector<1x1x128xi32>
    %c0_i32_2 = arith.constant 0 : i32
    %9 = arith.cmpi slt, %2, %c0_i32_2 : i32
    %10 = vector.broadcast %9 : i1 to vector<1x1x128xi1>
    %11 = vector.broadcast %10 : vector<1x1x128xi1> to vector<1x1x128xi1>
    %12 = arith.xori %8, %11 : vector<1x1x128xi1>
    %13 = arith.andi %12, %6 : vector<1x1x128xi1>
    %14 = vector.broadcast %2 : i32 to vector<1x1x128xi32>
    %15 = arith.addi %4, %14 : vector<1x1x128xi32>
    %16 = arith.select %13, %15, %4 : vector<1x1x128xi1>, vector<1x1x128xi32>
    %c15_i32 = arith.constant 15 : i32
    %17 = vector.broadcast %c15_i32 : i32 to vector<1x1x128xi32>
    %18 = arith.cmpi slt, %16, %17 : vector<1x1x128xi32>
    %c0_i32_3 = arith.constant 0 : i32
    %19 = vector.broadcast %c0_i32_3 : i32 to vector<1x1x128xi32>
    %20 = arith.cmpi sgt, %16, %19 : vector<1x1x128xi32>
    %21 = tpu.iota {dimensions = array<i32: 1>} : vector<1x16x1xi32>
    %c15_i32_4 = arith.constant 15 : i32
    %22 = vector.broadcast %c15_i32_4 : i32 to vector<1x16x1xi32>
    %23 = arith.cmpi slt, %21, %22 : vector<1x16x1xi32>
    %c0_i32_5 = arith.constant 0 : i32
    %24 = vector.broadcast %c0_i32_5 : i32 to vector<1x16x1xi32>
    %25 = arith.cmpi sgt, %21, %24 : vector<1x16x1xi32>
    %c0 = arith.constant 0 : index
    %26 = memref.load %arg2[%c0] : memref<36xf32, #tpu.memory_space<smem>>
    %c1 = arith.constant 1 : index
    %27 = memref.load %arg2[%c1] : memref<36xf32, #tpu.memory_space<smem>>
    %c2 = arith.constant 2 : index
    %28 = memref.load %arg2[%c2] : memref<36xf32, #tpu.memory_space<smem>>
    %c3 = arith.constant 3 : index
    %29 = memref.load %arg2[%c3] : memref<36xf32, #tpu.memory_space<smem>>
    %c4 = arith.constant 4 : index
    %30 = memref.load %arg2[%c4] : memref<36xf32, #tpu.memory_space<smem>>
    %c5 = arith.constant 5 : index
    %31 = memref.load %arg2[%c5] : memref<36xf32, #tpu.memory_space<smem>>
    %c6 = arith.constant 6 : index
    %32 = memref.load %arg2[%c6] : memref<36xf32, #tpu.memory_space<smem>>
    %c7 = arith.constant 7 : index
    %33 = memref.load %arg2[%c7] : memref<36xf32, #tpu.memory_space<smem>>
    %c8 = arith.constant 8 : index
    %34 = memref.load %arg2[%c8] : memref<36xf32, #tpu.memory_space<smem>>
    %c9 = arith.constant 9 : index
    %35 = memref.load %arg2[%c9] : memref<36xf32, #tpu.memory_space<smem>>
    %c10 = arith.constant 10 : index
    %36 = memref.load %arg2[%c10] : memref<36xf32, #tpu.memory_space<smem>>
    %c11 = arith.constant 11 : index
    %37 = memref.load %arg2[%c11] : memref<36xf32, #tpu.memory_space<smem>>
    %c12 = arith.constant 12 : index
    %38 = memref.load %arg2[%c12] : memref<36xf32, #tpu.memory_space<smem>>
    %c13 = arith.constant 13 : index
    %39 = memref.load %arg2[%c13] : memref<36xf32, #tpu.memory_space<smem>>
    %c14 = arith.constant 14 : index
    %40 = memref.load %arg2[%c14] : memref<36xf32, #tpu.memory_space<smem>>
    %c15 = arith.constant 15 : index
    %41 = memref.load %arg2[%c15] : memref<36xf32, #tpu.memory_space<smem>>
    %c16 = arith.constant 16 : index
    %42 = memref.load %arg2[%c16] : memref<36xf32, #tpu.memory_space<smem>>
    %c17 = arith.constant 17 : index
    %43 = memref.load %arg2[%c17] : memref<36xf32, #tpu.memory_space<smem>>
    %c18 = arith.constant 18 : index
    %44 = memref.load %arg2[%c18] : memref<36xf32, #tpu.memory_space<smem>>
    %c19 = arith.constant 19 : index
    %45 = memref.load %arg2[%c19] : memref<36xf32, #tpu.memory_space<smem>>
    %c20 = arith.constant 20 : index
    %46 = memref.load %arg2[%c20] : memref<36xf32, #tpu.memory_space<smem>>
    %c21 = arith.constant 21 : index
    %47 = memref.load %arg2[%c21] : memref<36xf32, #tpu.memory_space<smem>>
    %c22 = arith.constant 22 : index
    %48 = memref.load %arg2[%c22] : memref<36xf32, #tpu.memory_space<smem>>
    %c23 = arith.constant 23 : index
    %49 = memref.load %arg2[%c23] : memref<36xf32, #tpu.memory_space<smem>>
    %c24 = arith.constant 24 : index
    %50 = memref.load %arg2[%c24] : memref<36xf32, #tpu.memory_space<smem>>
    %c25 = arith.constant 25 : index
    %51 = memref.load %arg2[%c25] : memref<36xf32, #tpu.memory_space<smem>>
    %c26 = arith.constant 26 : index
    %52 = memref.load %arg2[%c26] : memref<36xf32, #tpu.memory_space<smem>>
    %c27 = arith.constant 27 : index
    %53 = memref.load %arg2[%c27] : memref<36xf32, #tpu.memory_space<smem>>
    %c28 = arith.constant 28 : index
    %54 = memref.load %arg2[%c28] : memref<36xf32, #tpu.memory_space<smem>>
    %c29 = arith.constant 29 : index
    %55 = memref.load %arg2[%c29] : memref<36xf32, #tpu.memory_space<smem>>
    %c30 = arith.constant 30 : index
    %56 = memref.load %arg2[%c30] : memref<36xf32, #tpu.memory_space<smem>>
    %c31 = arith.constant 31 : index
    %57 = memref.load %arg2[%c31] : memref<36xf32, #tpu.memory_space<smem>>
    %c32 = arith.constant 32 : index
    %58 = memref.load %arg2[%c32] : memref<36xf32, #tpu.memory_space<smem>>
    %c33 = arith.constant 33 : index
    %59 = memref.load %arg2[%c33] : memref<36xf32, #tpu.memory_space<smem>>
    %c34 = arith.constant 34 : index
    %60 = memref.load %arg2[%c34] : memref<36xf32, #tpu.memory_space<smem>>
    %c35 = arith.constant 35 : index
    %61 = memref.load %arg2[%c35] : memref<36xf32, #tpu.memory_space<smem>>
    %c0_6 = arith.constant 0 : index
    %62 = memref.load %arg3[%c0_6] : memref<4xf32, #tpu.memory_space<smem>>
    %c1_7 = arith.constant 1 : index
    %63 = memref.load %arg3[%c1_7] : memref<4xf32, #tpu.memory_space<smem>>
    %c2_8 = arith.constant 2 : index
    %64 = memref.load %arg3[%c2_8] : memref<4xf32, #tpu.memory_space<smem>>
    %c3_9 = arith.constant 3 : index
    %65 = memref.load %arg3[%c3_9] : memref<4xf32, #tpu.memory_space<smem>>
    %c0_10 = arith.constant 0 : index
    %c0_11 = arith.constant 0 : index
    %c0_12 = arith.constant 0 : index
    %66 = vector.load %arg1[%c0_10, %c0_11, %c0_12] : memref<1x16x128xf32, #tpu.memory_space<vmem>>, vector<1x16x128xf32>
    %c1_i32_13 = arith.constant 1 : i32
    %67 = tpu.dynamic_rotate %66 by %c1_i32_13 dim 1 : vector<1x16x128xf32>, i32 -> vector<1x16x128xf32>
    %cst = arith.constant 0.000000e+00 : f32
    %68 = vector.shape_cast %25 : vector<1x16x1xi1> to vector<1x16x1xi1>
    %69 = vector.broadcast %68 : vector<1x16x1xi1> to vector<1x16x128xi1>
    %70 = vector.broadcast %cst : f32 to vector<1x16x128xf32>
    %71 = arith.select %69, %67, %70 : vector<1x16x128xi1>, vector<1x16x128xf32>
    %c1_i32_14 = arith.constant 1 : i32
    %72 = tpu.dynamic_rotate %71 by %c1_i32_14 dim 2 : vector<1x16x128xf32>, i32 -> vector<1x16x128xf32>
    %cst_15 = arith.constant 0.000000e+00 : f32
    %73 = vector.shape_cast %20 : vector<1x1x128xi1> to vector<1x1x128xi1>
    %74 = vector.broadcast %73 : vector<1x1x128xi1> to vector<1x16x128xi1>
    %75 = vector.broadcast %cst_15 : f32 to vector<1x16x128xf32>
    %76 = arith.select %74, %72, %75 : vector<1x16x128xi1>, vector<1x16x128xf32>
    %77 = vector.broadcast %26 : f32 to vector<1x16x128xf32>
    %78 = arith.mulf %76, %77 : vector<1x16x128xf32>
    %79 = vector.broadcast %35 : f32 to vector<1x16x128xf32>
    %80 = arith.mulf %76, %79 : vector<1x16x128xf32>
    %81 = vector.broadcast %44 : f32 to vector<1x16x128xf32>
    %82 = arith.mulf %76, %81 : vector<1x16x128xf32>
    %83 = vector.broadcast %53 : f32 to vector<1x16x128xf32>
    %84 = arith.mulf %76, %83 : vector<1x16x128xf32>
    %c1_i32_16 = arith.constant 1 : i32
    %85 = tpu.dynamic_rotate %66 by %c1_i32_16 dim 1 : vector<1x16x128xf32>, i32 -> vector<1x16x128xf32>
    %cst_17 = arith.constant 0.000000e+00 : f32
    %86 = vector.shape_cast %25 : vector<1x16x1xi1> to vector<1x16x1xi1>
    %87 = vector.broadcast %86 : vector<1x16x1xi1> to vector<1x16x128xi1>
    %88 = vector.broadcast %cst_17 : f32 to vector<1x16x128xf32>
    %89 = arith.select %87, %85, %88 : vector<1x16x128xi1>, vector<1x16x128xf32>
    %90 = vector.broadcast %27 : f32 to vector<1x16x128xf32>
    %91 = arith.mulf %89, %90 : vector<1x16x128xf32>
    %92 = arith.addf %78, %91 : vector<1x16x128xf32>
    %93 = vector.broadcast %36 : f32 to vector<1x16x128xf32>
    %94 = arith.mulf %89, %93 : vector<1x16x128xf32>
    %95 = arith.addf %80, %94 : vector<1x16x128xf32>
    %96 = vector.broadcast %45 : f32 to vector<1x16x128xf32>
    %97 = arith.mulf %89, %96 : vector<1x16x128xf32>
    %98 = arith.addf %82, %97 : vector<1x16x128xf32>
    %99 = vector.broadcast %54 : f32 to vector<1x16x128xf32>
    %100 = arith.mulf %89, %99 : vector<1x16x128xf32>
    %101 = arith.addf %84, %100 : vector<1x16x128xf32>
    %c1_i32_18 = arith.constant 1 : i32
    %102 = tpu.dynamic_rotate %66 by %c1_i32_18 dim 1 : vector<1x16x128xf32>, i32 -> vector<1x16x128xf32>
    %cst_19 = arith.constant 0.000000e+00 : f32
    %103 = vector.shape_cast %25 : vector<1x16x1xi1> to vector<1x16x1xi1>
    %104 = vector.broadcast %103 : vector<1x16x1xi1> to vector<1x16x128xi1>
    %105 = vector.broadcast %cst_19 : f32 to vector<1x16x128xf32>
    %106 = arith.select %104, %102, %105 : vector<1x16x128xi1>, vector<1x16x128xf32>
    %c127_i32 = arith.constant 127 : i32
    %107 = tpu.dynamic_rotate %106 by %c127_i32 dim 2 : vector<1x16x128xf32>, i32 -> vector<1x16x128xf32>
    %cst_20 = arith.constant 0.000000e+00 : f32
    %108 = vector.shape_cast %18 : vector<1x1x128xi1> to vector<1x1x128xi1>
    %109 = vector.broadcast %108 : vector<1x1x128xi1> to vector<1x16x128xi1>
    %110 = vector.broadcast %cst_20 : f32 to vector<1x16x128xf32>
    %111 = arith.select %109, %107, %110 : vector<1x16x128xi1>, vector<1x16x128xf32>
    %112 = vector.broadcast %28 : f32 to vector<1x16x128xf32>
    %113 = arith.mulf %111, %112 : vector<1x16x128xf32>
    %114 = arith.addf %92, %113 : vector<1x16x128xf32>
    %115 = vector.broadcast %37 : f32 to vector<1x16x128xf32>
    %116 = arith.mulf %111, %115 : vector<1x16x128xf32>
    %117 = arith.addf %95, %116 : vector<1x16x128xf32>
    %118 = vector.broadcast %46 : f32 to vector<1x16x128xf32>
    %119 = arith.mulf %111, %118 : vector<1x16x128xf32>
    %120 = arith.addf %98, %119 : vector<1x16x128xf32>
    %121 = vector.broadcast %55 : f32 to vector<1x16x128xf32>
    %122 = arith.mulf %111, %121 : vector<1x16x128xf32>
    %123 = arith.addf %101, %122 : vector<1x16x128xf32>
    %c1_i32_21 = arith.constant 1 : i32
    %124 = tpu.dynamic_rotate %66 by %c1_i32_21 dim 2 : vector<1x16x128xf32>, i32 -> vector<1x16x128xf32>
    %cst_22 = arith.constant 0.000000e+00 : f32
    %125 = vector.shape_cast %20 : vector<1x1x128xi1> to vector<1x1x128xi1>
    %126 = vector.broadcast %125 : vector<1x1x128xi1> to vector<1x16x128xi1>
    %127 = vector.broadcast %cst_22 : f32 to vector<1x16x128xf32>
    %128 = arith.select %126, %124, %127 : vector<1x16x128xi1>, vector<1x16x128xf32>
    %129 = vector.broadcast %29 : f32 to vector<1x16x128xf32>
    %130 = arith.mulf %128, %129 : vector<1x16x128xf32>
    %131 = arith.addf %114, %130 : vector<1x16x128xf32>
    %132 = vector.broadcast %38 : f32 to vector<1x16x128xf32>
    %133 = arith.mulf %128, %132 : vector<1x16x128xf32>
    %134 = arith.addf %117, %133 : vector<1x16x128xf32>
    %135 = vector.broadcast %47 : f32 to vector<1x16x128xf32>
    %136 = arith.mulf %128, %135 : vector<1x16x128xf32>
    %137 = arith.addf %120, %136 : vector<1x16x128xf32>
    %138 = vector.broadcast %56 : f32 to vector<1x16x128xf32>
    %139 = arith.mulf %128, %138 : vector<1x16x128xf32>
    %140 = arith.addf %123, %139 : vector<1x16x128xf32>
    %141 = vector.broadcast %30 : f32 to vector<1x16x128xf32>
    %142 = arith.mulf %66, %141 : vector<1x16x128xf32>
    %143 = arith.addf %131, %142 : vector<1x16x128xf32>
    %144 = vector.broadcast %39 : f32 to vector<1x16x128xf32>
    %145 = arith.mulf %66, %144 : vector<1x16x128xf32>
    %146 = arith.addf %134, %145 : vector<1x16x128xf32>
    %147 = vector.broadcast %48 : f32 to vector<1x16x128xf32>
    %148 = arith.mulf %66, %147 : vector<1x16x128xf32>
    %149 = arith.addf %137, %148 : vector<1x16x128xf32>
    %150 = vector.broadcast %57 : f32 to vector<1x16x128xf32>
    %151 = arith.mulf %66, %150 : vector<1x16x128xf32>
    %152 = arith.addf %140, %151 : vector<1x16x128xf32>
    %c127_i32_23 = arith.constant 127 : i32
    %153 = tpu.dynamic_rotate %66 by %c127_i32_23 dim 2 : vector<1x16x128xf32>, i32 -> vector<1x16x128xf32>
    %cst_24 = arith.constant 0.000000e+00 : f32
    %154 = vector.shape_cast %18 : vector<1x1x128xi1> to vector<1x1x128xi1>
    %155 = vector.broadcast %154 : vector<1x1x128xi1> to vector<1x16x128xi1>
    %156 = vector.broadcast %cst_24 : f32 to vector<1x16x128xf32>
    %157 = arith.select %155, %153, %156 : vector<1x16x128xi1>, vector<1x16x128xf32>
    %158 = vector.broadcast %31 : f32 to vector<1x16x128xf32>
    %159 = arith.mulf %157, %158 : vector<1x16x128xf32>
    %160 = arith.addf %143, %159 : vector<1x16x128xf32>
    %161 = vector.broadcast %40 : f32 to vector<1x16x128xf32>
    %162 = arith.mulf %157, %161 : vector<1x16x128xf32>
    %163 = arith.addf %146, %162 : vector<1x16x128xf32>
    %164 = vector.broadcast %49 : f32 to vector<1x16x128xf32>
    %165 = arith.mulf %157, %164 : vector<1x16x128xf32>
    %166 = arith.addf %149, %165 : vector<1x16x128xf32>
    %167 = vector.broadcast %58 : f32 to vector<1x16x128xf32>
    %168 = arith.mulf %157, %167 : vector<1x16x128xf32>
    %169 = arith.addf %152, %168 : vector<1x16x128xf32>
    %c15_i32_25 = arith.constant 15 : i32
    %170 = tpu.dynamic_rotate %66 by %c15_i32_25 dim 1 : vector<1x16x128xf32>, i32 -> vector<1x16x128xf32>
    %cst_26 = arith.constant 0.000000e+00 : f32
    %171 = vector.shape_cast %23 : vector<1x16x1xi1> to vector<1x16x1xi1>
    %172 = vector.broadcast %171 : vector<1x16x1xi1> to vector<1x16x128xi1>
    %173 = vector.broadcast %cst_26 : f32 to vector<1x16x128xf32>
    %174 = arith.select %172, %170, %173 : vector<1x16x128xi1>, vector<1x16x128xf32>
    %c1_i32_27 = arith.constant 1 : i32
    %175 = tpu.dynamic_rotate %174 by %c1_i32_27 dim 2 : vector<1x16x128xf32>, i32 -> vector<1x16x128xf32>
    %cst_28 = arith.constant 0.000000e+00 : f32
    %176 = vector.shape_cast %20 : vector<1x1x128xi1> to vector<1x1x128xi1>
    %177 = vector.broadcast %176 : vector<1x1x128xi1> to vector<1x16x128xi1>
    %178 = vector.broadcast %cst_28 : f32 to vector<1x16x128xf32>
    %179 = arith.select %177, %175, %178 : vector<1x16x128xi1>, vector<1x16x128xf32>
    %180 = vector.broadcast %32 : f32 to vector<1x16x128xf32>
    %181 = arith.mulf %179, %180 : vector<1x16x128xf32>
    %182 = arith.addf %160, %181 : vector<1x16x128xf32>
    %183 = vector.broadcast %41 : f32 to vector<1x16x128xf32>
    %184 = arith.mulf %179, %183 : vector<1x16x128xf32>
    %185 = arith.addf %163, %184 : vector<1x16x128xf32>
    %186 = vector.broadcast %50 : f32 to vector<1x16x128xf32>
    %187 = arith.mulf %179, %186 : vector<1x16x128xf32>
    %188 = arith.addf %166, %187 : vector<1x16x128xf32>
    %189 = vector.broadcast %59 : f32 to vector<1x16x128xf32>
    %190 = arith.mulf %179, %189 : vector<1x16x128xf32>
    %191 = arith.addf %169, %190 : vector<1x16x128xf32>
    %c15_i32_29 = arith.constant 15 : i32
    %192 = tpu.dynamic_rotate %66 by %c15_i32_29 dim 1 : vector<1x16x128xf32>, i32 -> vector<1x16x128xf32>
    %cst_30 = arith.constant 0.000000e+00 : f32
    %193 = vector.shape_cast %23 : vector<1x16x1xi1> to vector<1x16x1xi1>
    %194 = vector.broadcast %193 : vector<1x16x1xi1> to vector<1x16x128xi1>
    %195 = vector.broadcast %cst_30 : f32 to vector<1x16x128xf32>
    %196 = arith.select %194, %192, %195 : vector<1x16x128xi1>, vector<1x16x128xf32>
    %197 = vector.broadcast %33 : f32 to vector<1x16x128xf32>
    %198 = arith.mulf %196, %197 : vector<1x16x128xf32>
    %199 = arith.addf %182, %198 : vector<1x16x128xf32>
    %200 = vector.broadcast %42 : f32 to vector<1x16x128xf32>
    %201 = arith.mulf %196, %200 : vector<1x16x128xf32>
    %202 = arith.addf %185, %201 : vector<1x16x128xf32>
    %203 = vector.broadcast %51 : f32 to vector<1x16x128xf32>
    %204 = arith.mulf %196, %203 : vector<1x16x128xf32>
    %205 = arith.addf %188, %204 : vector<1x16x128xf32>
    %206 = vector.broadcast %60 : f32 to vector<1x16x128xf32>
    %207 = arith.mulf %196, %206 : vector<1x16x128xf32>
    %208 = arith.addf %191, %207 : vector<1x16x128xf32>
    %c15_i32_31 = arith.constant 15 : i32
    %209 = tpu.dynamic_rotate %66 by %c15_i32_31 dim 1 : vector<1x16x128xf32>, i32 -> vector<1x16x128xf32>
    %cst_32 = arith.constant 0.000000e+00 : f32
    %210 = vector.shape_cast %23 : vector<1x16x1xi1> to vector<1x16x1xi1>
    %211 = vector.broadcast %210 : vector<1x16x1xi1> to vector<1x16x128xi1>
    %212 = vector.broadcast %cst_32 : f32 to vector<1x16x128xf32>
    %213 = arith.select %211, %209, %212 : vector<1x16x128xi1>, vector<1x16x128xf32>
    %c127_i32_33 = arith.constant 127 : i32
    %214 = tpu.dynamic_rotate %213 by %c127_i32_33 dim 2 : vector<1x16x128xf32>, i32 -> vector<1x16x128xf32>
    %cst_34 = arith.constant 0.000000e+00 : f32
    %215 = vector.shape_cast %18 : vector<1x1x128xi1> to vector<1x1x128xi1>
    %216 = vector.broadcast %215 : vector<1x1x128xi1> to vector<1x16x128xi1>
    %217 = vector.broadcast %cst_34 : f32 to vector<1x16x128xf32>
    %218 = arith.select %216, %214, %217 : vector<1x16x128xi1>, vector<1x16x128xf32>
    %219 = vector.broadcast %34 : f32 to vector<1x16x128xf32>
    %220 = arith.mulf %218, %219 : vector<1x16x128xf32>
    %221 = arith.addf %199, %220 : vector<1x16x128xf32>
    %222 = vector.broadcast %43 : f32 to vector<1x16x128xf32>
    %223 = arith.mulf %218, %222 : vector<1x16x128xf32>
    %224 = arith.addf %202, %223 : vector<1x16x128xf32>
    %225 = vector.broadcast %52 : f32 to vector<1x16x128xf32>
    %226 = arith.mulf %218, %225 : vector<1x16x128xf32>
    %227 = arith.addf %205, %226 : vector<1x16x128xf32>
    %228 = vector.broadcast %61 : f32 to vector<1x16x128xf32>
    %229 = arith.mulf %218, %228 : vector<1x16x128xf32>
    %230 = arith.addf %208, %229 : vector<1x16x128xf32>
    %231 = vector.broadcast %62 : f32 to vector<1x16x128xf32>
    %232 = arith.addf %221, %231 : vector<1x16x128xf32>
    %cst_35 = arith.constant 0.000000e+00 : f32
    %233 = vector.broadcast %cst_35 : f32 to vector<1x16x128xf32>
    %234 = arith.maximumf %232, %233 : vector<1x16x128xf32>
    %235 = vector.broadcast %63 : f32 to vector<1x16x128xf32>
    %236 = arith.addf %224, %235 : vector<1x16x128xf32>
    %cst_36 = arith.constant 0.000000e+00 : f32
    %237 = vector.broadcast %cst_36 : f32 to vector<1x16x128xf32>
    %238 = arith.maximumf %236, %237 : vector<1x16x128xf32>
    %239 = vector.broadcast %64 : f32 to vector<1x16x128xf32>
    %240 = arith.addf %227, %239 : vector<1x16x128xf32>
    %cst_37 = arith.constant 0.000000e+00 : f32
    %241 = vector.broadcast %cst_37 : f32 to vector<1x16x128xf32>
    %242 = arith.maximumf %240, %241 : vector<1x16x128xf32>
    %243 = vector.broadcast %65 : f32 to vector<1x16x128xf32>
    %244 = arith.addf %230, %243 : vector<1x16x128xf32>
    %cst_38 = arith.constant 0.000000e+00 : f32
    %245 = vector.broadcast %cst_38 : f32 to vector<1x16x128xf32>
    %246 = arith.maximumf %244, %245 : vector<1x16x128xf32>
    %c0_39 = arith.constant 0 : index
    %c0_40 = arith.constant 0 : index
    %c0_41 = arith.constant 0 : index
    %c0_42 = arith.constant 0 : index
    %247 = vector.load %arg4[%c0_39, %c0_40, %c0_41, %c0_42] : memref<9x4x1x128xf32, #tpu.memory_space<vmem>>, vector<1x1x1x128xf32>
    %248 = vector.shape_cast %247 : vector<1x1x1x128xf32> to vector<1x128xf32>
    %249 = vector.shape_cast %248 : vector<1x128xf32> to vector<1x1x128xf32>
    %250 = vector.broadcast %249 : vector<1x1x128xf32> to vector<1x16x128xf32>
    %251 = arith.mulf %234, %250 : vector<1x16x128xf32>
    %c0_43 = arith.constant 0 : index
    %c1_44 = arith.constant 1 : index
    %c0_45 = arith.constant 0 : index
    %c0_46 = arith.constant 0 : index
    %252 = vector.load %arg4[%c0_43, %c1_44, %c0_45, %c0_46] : memref<9x4x1x128xf32, #tpu.memory_space<vmem>>, vector<1x1x1x128xf32>
    %253 = vector.shape_cast %252 : vector<1x1x1x128xf32> to vector<1x128xf32>
    %254 = vector.shape_cast %253 : vector<1x128xf32> to vector<1x1x128xf32>
    %255 = vector.broadcast %254 : vector<1x1x128xf32> to vector<1x16x128xf32>
    %256 = arith.mulf %238, %255 : vector<1x16x128xf32>
    %257 = arith.addf %251, %256 : vector<1x16x128xf32>
    %c0_47 = arith.constant 0 : index
    %c2_48 = arith.constant 2 : index
    %c0_49 = arith.constant 0 : index
    %c0_50 = arith.constant 0 : index
    %258 = vector.load %arg4[%c0_47, %c2_48, %c0_49, %c0_50] : memref<9x4x1x128xf32, #tpu.memory_space<vmem>>, vector<1x1x1x128xf32>
    %259 = vector.shape_cast %258 : vector<1x1x1x128xf32> to vector<1x128xf32>
    %260 = vector.shape_cast %259 : vector<1x128xf32> to vector<1x1x128xf32>
    %261 = vector.broadcast %260 : vector<1x1x128xf32> to vector<1x16x128xf32>
    %262 = arith.mulf %242, %261 : vector<1x16x128xf32>
    %263 = arith.addf %257, %262 : vector<1x16x128xf32>
    %c0_51 = arith.constant 0 : index
    %c3_52 = arith.constant 3 : index
    %c0_53 = arith.constant 0 : index
    %c0_54 = arith.constant 0 : index
    %264 = vector.load %arg4[%c0_51, %c3_52, %c0_53, %c0_54] : memref<9x4x1x128xf32, #tpu.memory_space<vmem>>, vector<1x1x1x128xf32>
    %265 = vector.shape_cast %264 : vector<1x1x1x128xf32> to vector<1x128xf32>
    %266 = vector.shape_cast %265 : vector<1x128xf32> to vector<1x1x128xf32>
    %267 = vector.broadcast %266 : vector<1x1x128xf32> to vector<1x16x128xf32>
    %268 = arith.mulf %246, %267 : vector<1x16x128xf32>
    %269 = arith.addf %263, %268 : vector<1x16x128xf32>
    %c1_i32_55 = arith.constant 1 : i32
    %270 = tpu.dynamic_rotate %269 by %c1_i32_55 dim 1 : vector<1x16x128xf32>, i32 -> vector<1x16x128xf32>
    %cst_56 = arith.constant 0.000000e+00 : f32
    %271 = vector.shape_cast %25 : vector<1x16x1xi1> to vector<1x16x1xi1>
    %272 = vector.broadcast %271 : vector<1x16x1xi1> to vector<1x16x128xi1>
    %273 = vector.broadcast %cst_56 : f32 to vector<1x16x128xf32>
    %274 = arith.select %272, %270, %273 : vector<1x16x128xi1>, vector<1x16x128xf32>
    %c1_i32_57 = arith.constant 1 : i32
    %275 = tpu.dynamic_rotate %274 by %c1_i32_57 dim 2 : vector<1x16x128xf32>, i32 -> vector<1x16x128xf32>
    %cst_58 = arith.constant 0.000000e+00 : f32
    %276 = vector.shape_cast %20 : vector<1x1x128xi1> to vector<1x1x128xi1>
    %277 = vector.broadcast %276 : vector<1x1x128xi1> to vector<1x16x128xi1>
    %278 = vector.broadcast %cst_58 : f32 to vector<1x16x128xf32>
    %279 = arith.select %277, %275, %278 : vector<1x16x128xi1>, vector<1x16x128xf32>
    %c1_59 = arith.constant 1 : index
    %c0_60 = arith.constant 0 : index
    %c0_61 = arith.constant 0 : index
    %c0_62 = arith.constant 0 : index
    %280 = vector.load %arg4[%c1_59, %c0_60, %c0_61, %c0_62] : memref<9x4x1x128xf32, #tpu.memory_space<vmem>>, vector<1x1x1x128xf32>
    %281 = vector.shape_cast %280 : vector<1x1x1x128xf32> to vector<1x128xf32>
    %282 = vector.shape_cast %281 : vector<1x128xf32> to vector<1x1x128xf32>
    %283 = vector.broadcast %282 : vector<1x1x128xf32> to vector<1x16x128xf32>
    %284 = arith.mulf %234, %283 : vector<1x16x128xf32>
    %c1_63 = arith.constant 1 : index
    %c1_64 = arith.constant 1 : index
    %c0_65 = arith.constant 0 : index
    %c0_66 = arith.constant 0 : index
    %285 = vector.load %arg4[%c1_63, %c1_64, %c0_65, %c0_66] : memref<9x4x1x128xf32, #tpu.memory_space<vmem>>, vector<1x1x1x128xf32>
    %286 = vector.shape_cast %285 : vector<1x1x1x128xf32> to vector<1x128xf32>
    %287 = vector.shape_cast %286 : vector<1x128xf32> to vector<1x1x128xf32>
    %288 = vector.broadcast %287 : vector<1x1x128xf32> to vector<1x16x128xf32>
    %289 = arith.mulf %238, %288 : vector<1x16x128xf32>
    %290 = arith.addf %284, %289 : vector<1x16x128xf32>
    %c1_67 = arith.constant 1 : index
    %c2_68 = arith.constant 2 : index
    %c0_69 = arith.constant 0 : index
    %c0_70 = arith.constant 0 : index
    %291 = vector.load %arg4[%c1_67, %c2_68, %c0_69, %c0_70] : memref<9x4x1x128xf32, #tpu.memory_space<vmem>>, vector<1x1x1x128xf32>
    %292 = vector.shape_cast %291 : vector<1x1x1x128xf32> to vector<1x128xf32>
    %293 = vector.shape_cast %292 : vector<1x128xf32> to vector<1x1x128xf32>
    %294 = vector.broadcast %293 : vector<1x1x128xf32> to vector<1x16x128xf32>
    %295 = arith.mulf %242, %294 : vector<1x16x128xf32>
    %296 = arith.addf %290, %295 : vector<1x16x128xf32>
    %c1_71 = arith.constant 1 : index
    %c3_72 = arith.constant 3 : index
    %c0_73 = arith.constant 0 : index
    %c0_74 = arith.constant 0 : index
    %297 = vector.load %arg4[%c1_71, %c3_72, %c0_73, %c0_74] : memref<9x4x1x128xf32, #tpu.memory_space<vmem>>, vector<1x1x1x128xf32>
    %298 = vector.shape_cast %297 : vector<1x1x1x128xf32> to vector<1x128xf32>
    %299 = vector.shape_cast %298 : vector<1x128xf32> to vector<1x1x128xf32>
    %300 = vector.broadcast %299 : vector<1x1x128xf32> to vector<1x16x128xf32>
    %301 = arith.mulf %246, %300 : vector<1x16x128xf32>
    %302 = arith.addf %296, %301 : vector<1x16x128xf32>
    %c1_i32_75 = arith.constant 1 : i32
    %303 = tpu.dynamic_rotate %302 by %c1_i32_75 dim 1 : vector<1x16x128xf32>, i32 -> vector<1x16x128xf32>
    %cst_76 = arith.constant 0.000000e+00 : f32
    %304 = vector.shape_cast %25 : vector<1x16x1xi1> to vector<1x16x1xi1>
    %305 = vector.broadcast %304 : vector<1x16x1xi1> to vector<1x16x128xi1>
    %306 = vector.broadcast %cst_76 : f32 to vector<1x16x128xf32>
    %307 = arith.select %305, %303, %306 : vector<1x16x128xi1>, vector<1x16x128xf32>
    %308 = arith.addf %279, %307 : vector<1x16x128xf32>
    %c2_77 = arith.constant 2 : index
    %c0_78 = arith.constant 0 : index
    %c0_79 = arith.constant 0 : index
    %c0_80 = arith.constant 0 : index
    %309 = vector.load %arg4[%c2_77, %c0_78, %c0_79, %c0_80] : memref<9x4x1x128xf32, #tpu.memory_space<vmem>>, vector<1x1x1x128xf32>
    %310 = vector.shape_cast %309 : vector<1x1x1x128xf32> to vector<1x128xf32>
    %311 = vector.shape_cast %310 : vector<1x128xf32> to vector<1x1x128xf32>
    %312 = vector.broadcast %311 : vector<1x1x128xf32> to vector<1x16x128xf32>
    %313 = arith.mulf %234, %312 : vector<1x16x128xf32>
    %c2_81 = arith.constant 2 : index
    %c1_82 = arith.constant 1 : index
    %c0_83 = arith.constant 0 : index
    %c0_84 = arith.constant 0 : index
    %314 = vector.load %arg4[%c2_81, %c1_82, %c0_83, %c0_84] : memref<9x4x1x128xf32, #tpu.memory_space<vmem>>, vector<1x1x1x128xf32>
    %315 = vector.shape_cast %314 : vector<1x1x1x128xf32> to vector<1x128xf32>
    %316 = vector.shape_cast %315 : vector<1x128xf32> to vector<1x1x128xf32>
    %317 = vector.broadcast %316 : vector<1x1x128xf32> to vector<1x16x128xf32>
    %318 = arith.mulf %238, %317 : vector<1x16x128xf32>
    %319 = arith.addf %313, %318 : vector<1x16x128xf32>
    %c2_85 = arith.constant 2 : index
    %c2_86 = arith.constant 2 : index
    %c0_87 = arith.constant 0 : index
    %c0_88 = arith.constant 0 : index
    %320 = vector.load %arg4[%c2_85, %c2_86, %c0_87, %c0_88] : memref<9x4x1x128xf32, #tpu.memory_space<vmem>>, vector<1x1x1x128xf32>
    %321 = vector.shape_cast %320 : vector<1x1x1x128xf32> to vector<1x128xf32>
    %322 = vector.shape_cast %321 : vector<1x128xf32> to vector<1x1x128xf32>
    %323 = vector.broadcast %322 : vector<1x1x128xf32> to vector<1x16x128xf32>
    %324 = arith.mulf %242, %323 : vector<1x16x128xf32>
    %325 = arith.addf %319, %324 : vector<1x16x128xf32>
    %c2_89 = arith.constant 2 : index
    %c3_90 = arith.constant 3 : index
    %c0_91 = arith.constant 0 : index
    %c0_92 = arith.constant 0 : index
    %326 = vector.load %arg4[%c2_89, %c3_90, %c0_91, %c0_92] : memref<9x4x1x128xf32, #tpu.memory_space<vmem>>, vector<1x1x1x128xf32>
    %327 = vector.shape_cast %326 : vector<1x1x1x128xf32> to vector<1x128xf32>
    %328 = vector.shape_cast %327 : vector<1x128xf32> to vector<1x1x128xf32>
    %329 = vector.broadcast %328 : vector<1x1x128xf32> to vector<1x16x128xf32>
    %330 = arith.mulf %246, %329 : vector<1x16x128xf32>
    %331 = arith.addf %325, %330 : vector<1x16x128xf32>
    %c1_i32_93 = arith.constant 1 : i32
    %332 = tpu.dynamic_rotate %331 by %c1_i32_93 dim 1 : vector<1x16x128xf32>, i32 -> vector<1x16x128xf32>
    %cst_94 = arith.constant 0.000000e+00 : f32
    %333 = vector.shape_cast %25 : vector<1x16x1xi1> to vector<1x16x1xi1>
    %334 = vector.broadcast %333 : vector<1x16x1xi1> to vector<1x16x128xi1>
    %335 = vector.broadcast %cst_94 : f32 to vector<1x16x128xf32>
    %336 = arith.select %334, %332, %335 : vector<1x16x128xi1>, vector<1x16x128xf32>
    %c127_i32_95 = arith.constant 127 : i32
    %337 = tpu.dynamic_rotate %336 by %c127_i32_95 dim 2 : vector<1x16x128xf32>, i32 -> vector<1x16x128xf32>
    %cst_96 = arith.constant 0.000000e+00 : f32
    %338 = vector.shape_cast %18 : vector<1x1x128xi1> to vector<1x1x128xi1>
    %339 = vector.broadcast %338 : vector<1x1x128xi1> to vector<1x16x128xi1>
    %340 = vector.broadcast %cst_96 : f32 to vector<1x16x128xf32>
    %341 = arith.select %339, %337, %340 : vector<1x16x128xi1>, vector<1x16x128xf32>
    %342 = arith.addf %308, %341 : vector<1x16x128xf32>
    %c3_97 = arith.constant 3 : index
    %c0_98 = arith.constant 0 : index
    %c0_99 = arith.constant 0 : index
    %c0_100 = arith.constant 0 : index
    %343 = vector.load %arg4[%c3_97, %c0_98, %c0_99, %c0_100] : memref<9x4x1x128xf32, #tpu.memory_space<vmem>>, vector<1x1x1x128xf32>
    %344 = vector.shape_cast %343 : vector<1x1x1x128xf32> to vector<1x128xf32>
    %345 = vector.shape_cast %344 : vector<1x128xf32> to vector<1x1x128xf32>
    %346 = vector.broadcast %345 : vector<1x1x128xf32> to vector<1x16x128xf32>
    %347 = arith.mulf %234, %346 : vector<1x16x128xf32>
    %c3_101 = arith.constant 3 : index
    %c1_102 = arith.constant 1 : index
    %c0_103 = arith.constant 0 : index
    %c0_104 = arith.constant 0 : index
    %348 = vector.load %arg4[%c3_101, %c1_102, %c0_103, %c0_104] : memref<9x4x1x128xf32, #tpu.memory_space<vmem>>, vector<1x1x1x128xf32>
    %349 = vector.shape_cast %348 : vector<1x1x1x128xf32> to vector<1x128xf32>
    %350 = vector.shape_cast %349 : vector<1x128xf32> to vector<1x1x128xf32>
    %351 = vector.broadcast %350 : vector<1x1x128xf32> to vector<1x16x128xf32>
    %352 = arith.mulf %238, %351 : vector<1x16x128xf32>
    %353 = arith.addf %347, %352 : vector<1x16x128xf32>
    %c3_105 = arith.constant 3 : index
    %c2_106 = arith.constant 2 : index
    %c0_107 = arith.constant 0 : index
    %c0_108 = arith.constant 0 : index
    %354 = vector.load %arg4[%c3_105, %c2_106, %c0_107, %c0_108] : memref<9x4x1x128xf32, #tpu.memory_space<vmem>>, vector<1x1x1x128xf32>
    %355 = vector.shape_cast %354 : vector<1x1x1x128xf32> to vector<1x128xf32>
    %356 = vector.shape_cast %355 : vector<1x128xf32> to vector<1x1x128xf32>
    %357 = vector.broadcast %356 : vector<1x1x128xf32> to vector<1x16x128xf32>
    %358 = arith.mulf %242, %357 : vector<1x16x128xf32>
    %359 = arith.addf %353, %358 : vector<1x16x128xf32>
    %c3_109 = arith.constant 3 : index
    %c3_110 = arith.constant 3 : index
    %c0_111 = arith.constant 0 : index
    %c0_112 = arith.constant 0 : index
    %360 = vector.load %arg4[%c3_109, %c3_110, %c0_111, %c0_112] : memref<9x4x1x128xf32, #tpu.memory_space<vmem>>, vector<1x1x1x128xf32>
    %361 = vector.shape_cast %360 : vector<1x1x1x128xf32> to vector<1x128xf32>
    %362 = vector.shape_cast %361 : vector<1x128xf32> to vector<1x1x128xf32>
    %363 = vector.broadcast %362 : vector<1x1x128xf32> to vector<1x16x128xf32>
    %364 = arith.mulf %246, %363 : vector<1x16x128xf32>
    %365 = arith.addf %359, %364 : vector<1x16x128xf32>
    %c1_i32_113 = arith.constant 1 : i32
    %366 = tpu.dynamic_rotate %365 by %c1_i32_113 dim 2 : vector<1x16x128xf32>, i32 -> vector<1x16x128xf32>
    %cst_114 = arith.constant 0.000000e+00 : f32
    %367 = vector.shape_cast %20 : vector<1x1x128xi1> to vector<1x1x128xi1>
    %368 = vector.broadcast %367 : vector<1x1x128xi1> to vector<1x16x128xi1>
    %369 = vector.broadcast %cst_114 : f32 to vector<1x16x128xf32>
    %370 = arith.select %368, %366, %369 : vector<1x16x128xi1>, vector<1x16x128xf32>
    %371 = arith.addf %342, %370 : vector<1x16x128xf32>
    %c4_115 = arith.constant 4 : index
    %c0_116 = arith.constant 0 : index
    %c0_117 = arith.constant 0 : index
    %c0_118 = arith.constant 0 : index
    %372 = vector.load %arg4[%c4_115, %c0_116, %c0_117, %c0_118] : memref<9x4x1x128xf32, #tpu.memory_space<vmem>>, vector<1x1x1x128xf32>
    %373 = vector.shape_cast %372 : vector<1x1x1x128xf32> to vector<1x128xf32>
    %374 = vector.shape_cast %373 : vector<1x128xf32> to vector<1x1x128xf32>
    %375 = vector.broadcast %374 : vector<1x1x128xf32> to vector<1x16x128xf32>
    %376 = arith.mulf %234, %375 : vector<1x16x128xf32>
    %c4_119 = arith.constant 4 : index
    %c1_120 = arith.constant 1 : index
    %c0_121 = arith.constant 0 : index
    %c0_122 = arith.constant 0 : index
    %377 = vector.load %arg4[%c4_119, %c1_120, %c0_121, %c0_122] : memref<9x4x1x128xf32, #tpu.memory_space<vmem>>, vector<1x1x1x128xf32>
    %378 = vector.shape_cast %377 : vector<1x1x1x128xf32> to vector<1x128xf32>
    %379 = vector.shape_cast %378 : vector<1x128xf32> to vector<1x1x128xf32>
    %380 = vector.broadcast %379 : vector<1x1x128xf32> to vector<1x16x128xf32>
    %381 = arith.mulf %238, %380 : vector<1x16x128xf32>
    %382 = arith.addf %376, %381 : vector<1x16x128xf32>
    %c4_123 = arith.constant 4 : index
    %c2_124 = arith.constant 2 : index
    %c0_125 = arith.constant 0 : index
    %c0_126 = arith.constant 0 : index
    %383 = vector.load %arg4[%c4_123, %c2_124, %c0_125, %c0_126] : memref<9x4x1x128xf32, #tpu.memory_space<vmem>>, vector<1x1x1x128xf32>
    %384 = vector.shape_cast %383 : vector<1x1x1x128xf32> to vector<1x128xf32>
    %385 = vector.shape_cast %384 : vector<1x128xf32> to vector<1x1x128xf32>
    %386 = vector.broadcast %385 : vector<1x1x128xf32> to vector<1x16x128xf32>
    %387 = arith.mulf %242, %386 : vector<1x16x128xf32>
    %388 = arith.addf %382, %387 : vector<1x16x128xf32>
    %c4_127 = arith.constant 4 : index
    %c3_128 = arith.constant 3 : index
    %c0_129 = arith.constant 0 : index
    %c0_130 = arith.constant 0 : index
    %389 = vector.load %arg4[%c4_127, %c3_128, %c0_129, %c0_130] : memref<9x4x1x128xf32, #tpu.memory_space<vmem>>, vector<1x1x1x128xf32>
    %390 = vector.shape_cast %389 : vector<1x1x1x128xf32> to vector<1x128xf32>
    %391 = vector.shape_cast %390 : vector<1x128xf32> to vector<1x1x128xf32>
    %392 = vector.broadcast %391 : vector<1x1x128xf32> to vector<1x16x128xf32>
    %393 = arith.mulf %246, %392 : vector<1x16x128xf32>
    %394 = arith.addf %388, %393 : vector<1x16x128xf32>
    %395 = arith.addf %371, %394 : vector<1x16x128xf32>
    %c5_131 = arith.constant 5 : index
    %c0_132 = arith.constant 0 : index
    %c0_133 = arith.constant 0 : index
    %c0_134 = arith.constant 0 : index
    %396 = vector.load %arg4[%c5_131, %c0_132, %c0_133, %c0_134] : memref<9x4x1x128xf32, #tpu.memory_space<vmem>>, vector<1x1x1x128xf32>
    %397 = vector.shape_cast %396 : vector<1x1x1x128xf32> to vector<1x128xf32>
    %398 = vector.shape_cast %397 : vector<1x128xf32> to vector<1x1x128xf32>
    %399 = vector.broadcast %398 : vector<1x1x128xf32> to vector<1x16x128xf32>
    %400 = arith.mulf %234, %399 : vector<1x16x128xf32>
    %c5_135 = arith.constant 5 : index
    %c1_136 = arith.constant 1 : index
    %c0_137 = arith.constant 0 : index
    %c0_138 = arith.constant 0 : index
    %401 = vector.load %arg4[%c5_135, %c1_136, %c0_137, %c0_138] : memref<9x4x1x128xf32, #tpu.memory_space<vmem>>, vector<1x1x1x128xf32>
    %402 = vector.shape_cast %401 : vector<1x1x1x128xf32> to vector<1x128xf32>
    %403 = vector.shape_cast %402 : vector<1x128xf32> to vector<1x1x128xf32>
    %404 = vector.broadcast %403 : vector<1x1x128xf32> to vector<1x16x128xf32>
    %405 = arith.mulf %238, %404 : vector<1x16x128xf32>
    %406 = arith.addf %400, %405 : vector<1x16x128xf32>
    %c5_139 = arith.constant 5 : index
    %c2_140 = arith.constant 2 : index
    %c0_141 = arith.constant 0 : index
    %c0_142 = arith.constant 0 : index
    %407 = vector.load %arg4[%c5_139, %c2_140, %c0_141, %c0_142] : memref<9x4x1x128xf32, #tpu.memory_space<vmem>>, vector<1x1x1x128xf32>
    %408 = vector.shape_cast %407 : vector<1x1x1x128xf32> to vector<1x128xf32>
    %409 = vector.shape_cast %408 : vector<1x128xf32> to vector<1x1x128xf32>
    %410 = vector.broadcast %409 : vector<1x1x128xf32> to vector<1x16x128xf32>
    %411 = arith.mulf %242, %410 : vector<1x16x128xf32>
    %412 = arith.addf %406, %411 : vector<1x16x128xf32>
    %c5_143 = arith.constant 5 : index
    %c3_144 = arith.constant 3 : index
    %c0_145 = arith.constant 0 : index
    %c0_146 = arith.constant 0 : index
    %413 = vector.load %arg4[%c5_143, %c3_144, %c0_145, %c0_146] : memref<9x4x1x128xf32, #tpu.memory_space<vmem>>, vector<1x1x1x128xf32>
    %414 = vector.shape_cast %413 : vector<1x1x1x128xf32> to vector<1x128xf32>
    %415 = vector.shape_cast %414 : vector<1x128xf32> to vector<1x1x128xf32>
    %416 = vector.broadcast %415 : vector<1x1x128xf32> to vector<1x16x128xf32>
    %417 = arith.mulf %246, %416 : vector<1x16x128xf32>
    %418 = arith.addf %412, %417 : vector<1x16x128xf32>
    %c127_i32_147 = arith.constant 127 : i32
    %419 = tpu.dynamic_rotate %418 by %c127_i32_147 dim 2 : vector<1x16x128xf32>, i32 -> vector<1x16x128xf32>
    %cst_148 = arith.constant 0.000000e+00 : f32
    %420 = vector.shape_cast %18 : vector<1x1x128xi1> to vector<1x1x128xi1>
    %421 = vector.broadcast %420 : vector<1x1x128xi1> to vector<1x16x128xi1>
    %422 = vector.broadcast %cst_148 : f32 to vector<1x16x128xf32>
    %423 = arith.select %421, %419, %422 : vector<1x16x128xi1>, vector<1x16x128xf32>
    %424 = arith.addf %395, %423 : vector<1x16x128xf32>
    %c6_149 = arith.constant 6 : index
    %c0_150 = arith.constant 0 : index
    %c0_151 = arith.constant 0 : index
    %c0_152 = arith.constant 0 : index
    %425 = vector.load %arg4[%c6_149, %c0_150, %c0_151, %c0_152] : memref<9x4x1x128xf32, #tpu.memory_space<vmem>>, vector<1x1x1x128xf32>
    %426 = vector.shape_cast %425 : vector<1x1x1x128xf32> to vector<1x128xf32>
    %427 = vector.shape_cast %426 : vector<1x128xf32> to vector<1x1x128xf32>
    %428 = vector.broadcast %427 : vector<1x1x128xf32> to vector<1x16x128xf32>
    %429 = arith.mulf %234, %428 : vector<1x16x128xf32>
    %c6_153 = arith.constant 6 : index
    %c1_154 = arith.constant 1 : index
    %c0_155 = arith.constant 0 : index
    %c0_156 = arith.constant 0 : index
    %430 = vector.load %arg4[%c6_153, %c1_154, %c0_155, %c0_156] : memref<9x4x1x128xf32, #tpu.memory_space<vmem>>, vector<1x1x1x128xf32>
    %431 = vector.shape_cast %430 : vector<1x1x1x128xf32> to vector<1x128xf32>
    %432 = vector.shape_cast %431 : vector<1x128xf32> to vector<1x1x128xf32>
    %433 = vector.broadcast %432 : vector<1x1x128xf32> to vector<1x16x128xf32>
    %434 = arith.mulf %238, %433 : vector<1x16x128xf32>
    %435 = arith.addf %429, %434 : vector<1x16x128xf32>
    %c6_157 = arith.constant 6 : index
    %c2_158 = arith.constant 2 : index
    %c0_159 = arith.constant 0 : index
    %c0_160 = arith.constant 0 : index
    %436 = vector.load %arg4[%c6_157, %c2_158, %c0_159, %c0_160] : memref<9x4x1x128xf32, #tpu.memory_space<vmem>>, vector<1x1x1x128xf32>
    %437 = vector.shape_cast %436 : vector<1x1x1x128xf32> to vector<1x128xf32>
    %438 = vector.shape_cast %437 : vector<1x128xf32> to vector<1x1x128xf32>
    %439 = vector.broadcast %438 : vector<1x1x128xf32> to vector<1x16x128xf32>
    %440 = arith.mulf %242, %439 : vector<1x16x128xf32>
    %441 = arith.addf %435, %440 : vector<1x16x128xf32>
    %c6_161 = arith.constant 6 : index
    %c3_162 = arith.constant 3 : index
    %c0_163 = arith.constant 0 : index
    %c0_164 = arith.constant 0 : index
    %442 = vector.load %arg4[%c6_161, %c3_162, %c0_163, %c0_164] : memref<9x4x1x128xf32, #tpu.memory_space<vmem>>, vector<1x1x1x128xf32>
    %443 = vector.shape_cast %442 : vector<1x1x1x128xf32> to vector<1x128xf32>
    %444 = vector.shape_cast %443 : vector<1x128xf32> to vector<1x1x128xf32>
    %445 = vector.broadcast %444 : vector<1x1x128xf32> to vector<1x16x128xf32>
    %446 = arith.mulf %246, %445 : vector<1x16x128xf32>
    %447 = arith.addf %441, %446 : vector<1x16x128xf32>
    %c15_i32_165 = arith.constant 15 : i32
    %448 = tpu.dynamic_rotate %447 by %c15_i32_165 dim 1 : vector<1x16x128xf32>, i32 -> vector<1x16x128xf32>
    %cst_166 = arith.constant 0.000000e+00 : f32
    %449 = vector.shape_cast %23 : vector<1x16x1xi1> to vector<1x16x1xi1>
    %450 = vector.broadcast %449 : vector<1x16x1xi1> to vector<1x16x128xi1>
    %451 = vector.broadcast %cst_166 : f32 to vector<1x16x128xf32>
    %452 = arith.select %450, %448, %451 : vector<1x16x128xi1>, vector<1x16x128xf32>
    %c1_i32_167 = arith.constant 1 : i32
    %453 = tpu.dynamic_rotate %452 by %c1_i32_167 dim 2 : vector<1x16x128xf32>, i32 -> vector<1x16x128xf32>
    %cst_168 = arith.constant 0.000000e+00 : f32
    %454 = vector.shape_cast %20 : vector<1x1x128xi1> to vector<1x1x128xi1>
    %455 = vector.broadcast %454 : vector<1x1x128xi1> to vector<1x16x128xi1>
    %456 = vector.broadcast %cst_168 : f32 to vector<1x16x128xf32>
    %457 = arith.select %455, %453, %456 : vector<1x16x128xi1>, vector<1x16x128xf32>
    %458 = arith.addf %424, %457 : vector<1x16x128xf32>
    %c7_169 = arith.constant 7 : index
    %c0_170 = arith.constant 0 : index
    %c0_171 = arith.constant 0 : index
    %c0_172 = arith.constant 0 : index
    %459 = vector.load %arg4[%c7_169, %c0_170, %c0_171, %c0_172] : memref<9x4x1x128xf32, #tpu.memory_space<vmem>>, vector<1x1x1x128xf32>
    %460 = vector.shape_cast %459 : vector<1x1x1x128xf32> to vector<1x128xf32>
    %461 = vector.shape_cast %460 : vector<1x128xf32> to vector<1x1x128xf32>
    %462 = vector.broadcast %461 : vector<1x1x128xf32> to vector<1x16x128xf32>
    %463 = arith.mulf %234, %462 : vector<1x16x128xf32>
    %c7_173 = arith.constant 7 : index
    %c1_174 = arith.constant 1 : index
    %c0_175 = arith.constant 0 : index
    %c0_176 = arith.constant 0 : index
    %464 = vector.load %arg4[%c7_173, %c1_174, %c0_175, %c0_176] : memref<9x4x1x128xf32, #tpu.memory_space<vmem>>, vector<1x1x1x128xf32>
    %465 = vector.shape_cast %464 : vector<1x1x1x128xf32> to vector<1x128xf32>
    %466 = vector.shape_cast %465 : vector<1x128xf32> to vector<1x1x128xf32>
    %467 = vector.broadcast %466 : vector<1x1x128xf32> to vector<1x16x128xf32>
    %468 = arith.mulf %238, %467 : vector<1x16x128xf32>
    %469 = arith.addf %463, %468 : vector<1x16x128xf32>
    %c7_177 = arith.constant 7 : index
    %c2_178 = arith.constant 2 : index
    %c0_179 = arith.constant 0 : index
    %c0_180 = arith.constant 0 : index
    %470 = vector.load %arg4[%c7_177, %c2_178, %c0_179, %c0_180] : memref<9x4x1x128xf32, #tpu.memory_space<vmem>>, vector<1x1x1x128xf32>
    %471 = vector.shape_cast %470 : vector<1x1x1x128xf32> to vector<1x128xf32>
    %472 = vector.shape_cast %471 : vector<1x128xf32> to vector<1x1x128xf32>
    %473 = vector.broadcast %472 : vector<1x1x128xf32> to vector<1x16x128xf32>
    %474 = arith.mulf %242, %473 : vector<1x16x128xf32>
    %475 = arith.addf %469, %474 : vector<1x16x128xf32>
    %c7_181 = arith.constant 7 : index
    %c3_182 = arith.constant 3 : index
    %c0_183 = arith.constant 0 : index
    %c0_184 = arith.constant 0 : index
    %476 = vector.load %arg4[%c7_181, %c3_182, %c0_183, %c0_184] : memref<9x4x1x128xf32, #tpu.memory_space<vmem>>, vector<1x1x1x128xf32>
    %477 = vector.shape_cast %476 : vector<1x1x1x128xf32> to vector<1x128xf32>
    %478 = vector.shape_cast %477 : vector<1x128xf32> to vector<1x1x128xf32>
    %479 = vector.broadcast %478 : vector<1x1x128xf32> to vector<1x16x128xf32>
    %480 = arith.mulf %246, %479 : vector<1x16x128xf32>
    %481 = arith.addf %475, %480 : vector<1x16x128xf32>
    %c15_i32_185 = arith.constant 15 : i32
    %482 = tpu.dynamic_rotate %481 by %c15_i32_185 dim 1 : vector<1x16x128xf32>, i32 -> vector<1x16x128xf32>
    %cst_186 = arith.constant 0.000000e+00 : f32
    %483 = vector.shape_cast %23 : vector<1x16x1xi1> to vector<1x16x1xi1>
    %484 = vector.broadcast %483 : vector<1x16x1xi1> to vector<1x16x128xi1>
    %485 = vector.broadcast %cst_186 : f32 to vector<1x16x128xf32>
    %486 = arith.select %484, %482, %485 : vector<1x16x128xi1>, vector<1x16x128xf32>
    %487 = arith.addf %458, %486 : vector<1x16x128xf32>
    %c8_187 = arith.constant 8 : index
    %c0_188 = arith.constant 0 : index
    %c0_189 = arith.constant 0 : index
    %c0_190 = arith.constant 0 : index
    %488 = vector.load %arg4[%c8_187, %c0_188, %c0_189, %c0_190] : memref<9x4x1x128xf32, #tpu.memory_space<vmem>>, vector<1x1x1x128xf32>
    %489 = vector.shape_cast %488 : vector<1x1x1x128xf32> to vector<1x128xf32>
    %490 = vector.shape_cast %489 : vector<1x128xf32> to vector<1x1x128xf32>
    %491 = vector.broadcast %490 : vector<1x1x128xf32> to vector<1x16x128xf32>
    %492 = arith.mulf %234, %491 : vector<1x16x128xf32>
    %c8_191 = arith.constant 8 : index
    %c1_192 = arith.constant 1 : index
    %c0_193 = arith.constant 0 : index
    %c0_194 = arith.constant 0 : index
    %493 = vector.load %arg4[%c8_191, %c1_192, %c0_193, %c0_194] : memref<9x4x1x128xf32, #tpu.memory_space<vmem>>, vector<1x1x1x128xf32>
    %494 = vector.shape_cast %493 : vector<1x1x1x128xf32> to vector<1x128xf32>
    %495 = vector.shape_cast %494 : vector<1x128xf32> to vector<1x1x128xf32>
    %496 = vector.broadcast %495 : vector<1x1x128xf32> to vector<1x16x128xf32>
    %497 = arith.mulf %238, %496 : vector<1x16x128xf32>
    %498 = arith.addf %492, %497 : vector<1x16x128xf32>
    %c8_195 = arith.constant 8 : index
    %c2_196 = arith.constant 2 : index
    %c0_197 = arith.constant 0 : index
    %c0_198 = arith.constant 0 : index
    %499 = vector.load %arg4[%c8_195, %c2_196, %c0_197, %c0_198] : memref<9x4x1x128xf32, #tpu.memory_space<vmem>>, vector<1x1x1x128xf32>
    %500 = vector.shape_cast %499 : vector<1x1x1x128xf32> to vector<1x128xf32>
    %501 = vector.shape_cast %500 : vector<1x128xf32> to vector<1x1x128xf32>
    %502 = vector.broadcast %501 : vector<1x1x128xf32> to vector<1x16x128xf32>
    %503 = arith.mulf %242, %502 : vector<1x16x128xf32>
    %504 = arith.addf %498, %503 : vector<1x16x128xf32>
    %c8_199 = arith.constant 8 : index
    %c3_200 = arith.constant 3 : index
    %c0_201 = arith.constant 0 : index
    %c0_202 = arith.constant 0 : index
    %505 = vector.load %arg4[%c8_199, %c3_200, %c0_201, %c0_202] : memref<9x4x1x128xf32, #tpu.memory_space<vmem>>, vector<1x1x1x128xf32>
    %506 = vector.shape_cast %505 : vector<1x1x1x128xf32> to vector<1x128xf32>
    %507 = vector.shape_cast %506 : vector<1x128xf32> to vector<1x1x128xf32>
    %508 = vector.broadcast %507 : vector<1x1x128xf32> to vector<1x16x128xf32>
    %509 = arith.mulf %246, %508 : vector<1x16x128xf32>
    %510 = arith.addf %504, %509 : vector<1x16x128xf32>
    %c15_i32_203 = arith.constant 15 : i32
    %511 = tpu.dynamic_rotate %510 by %c15_i32_203 dim 1 : vector<1x16x128xf32>, i32 -> vector<1x16x128xf32>
    %cst_204 = arith.constant 0.000000e+00 : f32
    %512 = vector.shape_cast %23 : vector<1x16x1xi1> to vector<1x16x1xi1>
    %513 = vector.broadcast %512 : vector<1x16x1xi1> to vector<1x16x128xi1>
    %514 = vector.broadcast %cst_204 : f32 to vector<1x16x128xf32>
    %515 = arith.select %513, %511, %514 : vector<1x16x128xi1>, vector<1x16x128xf32>
    %c127_i32_205 = arith.constant 127 : i32
    %516 = tpu.dynamic_rotate %515 by %c127_i32_205 dim 2 : vector<1x16x128xf32>, i32 -> vector<1x16x128xf32>
    %cst_206 = arith.constant 0.000000e+00 : f32
    %517 = vector.shape_cast %18 : vector<1x1x128xi1> to vector<1x1x128xi1>
    %518 = vector.broadcast %517 : vector<1x1x128xi1> to vector<1x16x128xi1>
    %519 = vector.broadcast %cst_206 : f32 to vector<1x16x128xf32>
    %520 = arith.select %518, %516, %519 : vector<1x16x128xi1>, vector<1x16x128xf32>
    %521 = arith.addf %487, %520 : vector<1x16x128xf32>
    %c0_207 = arith.constant 0 : index
    %c0_208 = arith.constant 0 : index
    %522 = vector.load %arg5[%c0_207, %c0_208] : memref<1x128xf32, #tpu.memory_space<vmem>>, vector<1x128xf32>
    %523 = vector.shape_cast %522 : vector<1x128xf32> to vector<1x1x128xf32>
    %524 = vector.broadcast %523 : vector<1x1x128xf32> to vector<1x16x128xf32>
    %525 = arith.addf %521, %524 : vector<1x16x128xf32>
    %cst_209 = arith.constant 0.000000e+00 : f32
    %526 = vector.broadcast %cst_209 : f32 to vector<1x16x128xf32>
    %527 = arith.maximumf %525, %526 : vector<1x16x128xf32>
    %c0_210 = arith.constant 0 : index
    %c0_211 = arith.constant 0 : index
    %c0_212 = arith.constant 0 : index
    %528 = vector.load %arg6[%c0_210, %c0_211, %c0_212] : memref<1x16x128xf32, #tpu.memory_space<vmem>>, vector<1x16x128xf32>
    tpu.vector_store %arg6[%c0_210, %c0_211, %c0_212], %527 {strides = array<i32>} : memref<1x16x128xf32, #tpu.memory_space<vmem>>, vector<1x16x128xf32>,
    return
  }
  func.func @transform_0(%arg0: i32) -> (i32, i32, i32) {
    %c0_i32 = arith.constant 0 : i32
    %c0_i32_0 = arith.constant 0 : i32
    %c0_i32_1 = arith.constant 0 : i32
    return %arg0, %c0_i32, %c0_i32_0 : i32, i32, i32
  }
  func.func @transform_1(%arg0: i32) -> i32 {
    %c0_i32 = arith.constant 0 : i32
    %c0_i32_0 = arith.constant 0 : i32
    return %c0_i32 : i32
  }
  func.func @transform_2(%arg0: i32) -> i32 {
    %c0_i32 = arith.constant 0 : i32
    %c0_i32_0 = arith.constant 0 : i32
    return %c0_i32 : i32
  }
  func.func @transform_3(%arg0: i32) -> (i32, i32, i32, i32) {
    %c0_i32 = arith.constant 0 : i32
    %c0_i32_0 = arith.constant 0 : i32
    %c0_i32_1 = arith.constant 0 : i32
    %c0_i32_2 = arith.constant 0 : i32
    %c0_i32_3 = arith.constant 0 : i32
    return %c0_i32, %c0_i32_0, %c0_i32_1, %c0_i32_2 : i32, i32, i32, i32
  }
  func.func @transform_4(%arg0: i32) -> (i32, i32) {
    %c0_i32 = arith.constant 0 : i32
    %c0_i32_0 = arith.constant 0 : i32
    %c0_i32_1 = arith.constant 0 : i32
    return %c0_i32, %c0_i32_0 : i32, i32
  }
  func.func @transform_5(%arg0: i32) -> (i32, i32, i32) {
    %c0_i32 = arith.constant 0 : i32
    %c0_i32_0 = arith.constant 0 : i32
    %c0_i32_1 = arith.constant 0 : i32
    return %arg0, %c0_i32, %c0_i32_0 : i32, i32, i32
  }
}

</mosaic_0001>

<bundles_post_ra>
// kernel: tpu_custom_call.1
= control target key start
LH: loop header
LB: loop body
LE: loop exit
PB: predicated region body
PF: predicated region fallthrough
CT: control target
= control target key end

     0   :  { %s2309_s0 = inlined_call_operand.hbm [shape: f32[2,16,128], index: 0, kind: input, shape index: {}]   ;;  %s2310_s1 = inlined_call_operand.hbm [shape: f32[36], index: 1, kind: input, shape index: {}]   ;;  %s2311_s2 = inlined_call_operand.vmem [shape: f32[4], index: 2, kind: input, shape index: {}]   ;;  %s2312_s3 = inlined_call_operand.hbm [shape: f32[9,4,1,128], index: 3, kind: input, shape index: {}]   ;;  %s2313_s4 = inlined_call_operand.vmem [shape: f32[1,128], index: 4, kind: input, shape index: {}]   ;;  %s2314_s5 = inlined_call_operand.hbm [shape: f32[2,16,128], index: 5, kind: output, shape index: {}]  }
   0x1   :  { %2337 = sst [smem:[#allocation25_spill]] %s2309_s0 }
   0x2   :  { %2338 = sst [smem:[#allocation26_spill]] %s2310_s1 }
   0x3   :  { %2339 = sst [smem:[#allocation27_spill]] %s2311_s2 }
   0x4   :  { %2340 = sst [smem:[#allocation28_spill]] %s2312_s3 }
   0x5   :  { %2341 = sst [smem:[#allocation29_spill]] %s2314_s5 }
   0x6   :  { %10 = vsyncpa [#allocation3], 0 }
   0x7   :  { %12 = vsyncpa [#allocation3 + $0x1], 0 }
   0x8   :  { %13 = vsyncpa [#allocation5], 0 }
   0x9   :  { %14 = vsyncpa [#allocation6], 0 }
   0xa   :  { %15 = vsyncpa [#allocation10], 0 }
   0xb   :  { %16 = vsyncpa [#allocation4], 0 }
   0xc   :  { %18 = vsyncpa [#allocation4 + $0x1], 0  ;;  %s1527_s18 = smov 0   ;;  %s1529_s19 = smov 0  }
   0xd   :  { %s1531_s20 = smov 0   ;;  %s1533_s21 = smov 0  }
   0xe LB: > { %2342 = sst [smem:[#allocation17_spill]] %s1472_s18  ;;  %s1548_s22 = sadd.s32 4294967295, %s1484_s21   ;;  %s1484_s21 = sphi %s1533_s21, %s2399_s21   ;;  %s1480_s20 = sphi %s1531_s20, %s2402_s20   ;;  %s1476_s19 = sphi %s1529_s19, %s2401_s19   ;;  %s1472_s18 = sphi %s1527_s18, %s2400_s18  }
   0xf   : > { %2343 = sst [smem:[#allocation18_spill]] %s1476_s19  ;;  %s1134_s23 = sadd.s32 4294967294, %s1484_s21  }
  0x10   : > { %2344 = sst [smem:[#allocation19_spill]] %s1480_s20  ;;  %p44_p0 = scmp.ne.s32.totalorder %s1476_s19, %s1472_s18 }
  0x11   : > { %2345 = sst [smem:[#allocation20_spill]] %s1484_s21  ;;  %p45_p1 = scmp.eq.s32.totalorder %s1548_s22, 0 }
  0x12   : > { %p152_p2 = scmp.eq.s32.totalorder %s1548_s22, 1  ;;  %p158_p3 = scmp.eq.s32.totalorder %s1134_s23, 1 }
  0x13   : > { %p1557_p4 = por %p45_p1, %p44_p0  ;;  %p1135_p5 = scmp.ge.s32.totalorder %s1484_s21, 1 }
  0x14   : > { %p1562_p6 = por %p158_p3, %p44_p0  ;;  %p165_p7 = scmp.lt.s32.totalorder %s1484_s21, 3 }
  0x15   : > { %s2349_s1 = sld [smem:[#allocation26_spill]]  ;;  %s1486_s11 = smov [#allocation9]  }
  0x16   : > { %s2347_s25 = scalar_select %p1562_p6, 1, 0 }
  0x17   : > { %p1570_p8 = pnand %p1135_p5, %p165_p7  ;;  %s2351_s2 = sld [smem:[#allocation27_spill]] }
  0x18   : > { %2348 = sst [smem:[#allocation21_spill]] %s2347_s25  ;;  %s198_s12 = sshll.u32 %s1486_s11, 4  ;;  %s199_s12 = int_to_ptr.vmem [resolvable:$true] %s198_s12 }
  0x19   : > { %p1210_p10 = pneg %p1570_p8  ;;  %s2352_s3 = sld [smem:[#allocation28_spill]] }
  0x1a   : > { %s1487_s13 = smov [#allocation7]   ;;  %s1488_s14 = smov [#allocation8]  }
  0x1b   : > { %s177_s28 = sshll.u32 %s2349_s1, 4  ;;  %p1211_p11 = pnand %p1210_p10, %p45_p1  ;;  %s178_s28 = int_to_ptr.hbm [resolvable:$true] %s177_s28 }
  0x1c   : > { %s1489_s15 = smov 16   ;;  %s1490_s16 = smov 1  }
  0x1d   : > { %s187_s7 = sshll.u32 %s2351_s2, 4  ;;  %s1586_s17 = sadd.s32 1, %s1484_s21   ;;  %s188_s7 = int_to_ptr.vmem [resolvable:$true] %s187_s7 }
  0x1e   : > { %1213 = dma.hbm_to_smem (!%p1211_p11), %s178_s28, 16, %s1487_s13, [#allocation5]  }
  0x1f   : > { %s196_s10 = sshll.u32 %s2352_s3, 4  ;;  %2353 = sst [smem:[#allocation22_spill]] %s1586_s17  ;;  %s197_s10 = int_to_ptr.hbm [resolvable:$true] %s196_s10 }
  0x20   : > { %1216 = dma.vmem_to_smem (!%p1211_p11), %s188_s7, 16, %s1488_s14, [#allocation6]  }
  0x21   : > { %1219 = dma.hbm_to_vmem [thread:$0]  (!%p1211_p11), %s197_s10, 576, %s199_s12, [#allocation10], %s1489_s15, %s1489_s15, %s1490_s16  }
  0x22   : > { %s28_s23 = ssub.s32 %s1484_s21, %s1586_s17  ;;  %s31_s26 = sadd.s32 1, %s1480_s20 }
  0x23   : > { %p29_p12 = scmp.eq.s32.totalorder %s28_s23, 0  ;;  %p38_p13 = scmp.ne.s32.totalorder %s1480_s20, %s1476_s19 }
  0x24   : > { %p39_p0 = scmp.eq.s32.totalorder %s1484_s21, 0  ;;  %p1231_p3 = scmp.lt.s32.totalorder %s1484_s21, 2 }
  0x25   : > { %s1596_s27 = scalar_select %p29_p12, %s1480_s20, %s31_s26  }
  0x26   : > { %p40_p5 = por %p39_p0, %p38_p13  ;;  %p1600_p7 = por %p152_p2, %p38_p13 }
  0x27   : > { %2354 = sst [smem:[#allocation23_spill]] %s1596_s27  ;;  %s215_s30 = sand.u32 1, %s1480_s20  }
  0x28   : > { %s2355_s28 = scalar_select %p1600_p7, 1, 0 }
  0x29   : > { %s1192_s6 = sshll.u32 %s1484_s21, 4  ;;  %s1140_s7 = sshll.u32 %s215_s30, 4 }
  0x2a   : > { %2356 = sst [smem:[#allocation24_spill]] %s2355_s28  ;;  %s219_s12 = scalar_lea.vmem [#allocation2], %s1140_s7 }
  0x2b   : > { %s2357_s0 = sld [smem:[#allocation25_spill]]  ;;  %s227_s13 = sshll.u32 %s219_s12, 4  ;;  %s228_s13 = int_to_ptr.vmem [resolvable:$true] %s227_s13 }
  0x2c   : > { %p1611_p10 = pnand %p1231_p3, %p40_p5  ;;  %s216_s15 = scalar_lea.sflag [#allocation3], %s215_s30 }
  0x2e   : > { %p1380_p11 = pneg %p1611_p10 }
  0x31   : > { %s224_s10 = scalar_lea.hbm %s2357_s0, %s1192_s6  ;;  %s1383_s7 = scalar_lea.hbm %s2357_s0, 32 }
  0x32   : > { %s225_s11 = sshll.u32 %s224_s10, 4  ;;  %s226_s11 = int_to_ptr.hbm [resolvable:$true] %s225_s11 }
  0x33   : > { %s1376_s16 = sshra.s32 %s226_s11, 4  ;;  %s1377_s16 = int_to_ptr.hbm [resolvable:$true] %s1376_s16 }
  0x34   : > { %s1378_s23 = scalar_lea.hbm %s1377_s16, 16  ;;  %p1384_p0 = scmp.lt.s32.totalorder %s1377_s16, %s2357_s0 }
  0x35   : > { %p1379_p2 = scmp.ne.s32.totalorder %s1377_s16, %s1378_s23  ;;  %p1385_p3 = scmp.lt.s32.totalorder %s1383_s7, %s1378_s23 }
  0x37   : > { %p1381_p12 = pnand %p1380_p11, %p1379_p2  ;;  %p1386_p5 = por %p1385_p3, %p1384_p0 }
  0x39   : > { %p1382_p13 = pneg %p1381_p12 }
  0x3b   : > { %p1387_p9 = pnand %p1386_p5, %p1382_p13 }
  0x3d   : > { %1390 = shalt.err (!%p1387_p9)
}
  0x3e   : > { %s1491_s30 = smov 128   ;;  %s1492_s10 = smov 8  }
  0x3f   : > { %1223 = dma.hbm_to_vmem [thread:$0]  (!%p1611_p10), %s226_s11, 256, %s228_s13, %s216_s15, %s1491_s30, %s1491_s30, %s1492_s10  }
  0x40   : > { %239 = sbr.rel (%p1570_p8) target bundleno = 410 (0x19a), region = 40  ;;  %s1628_s12 = sand.u32 (!%p1570_p8), 1, %s1476_s19  }
  0x41   : > { %s2315_s16 = sshll.u32 (!%p1570_p8), %s1628_s12, 4  ;;  %s242_s23 = scalar_lea.sflag (!%p1570_p8), [#allocation3], %s1628_s12 }
  0x42   : > { %s245_s26 = scalar_lea.vmem (!%p1570_p8), [#allocation2], %s2315_s16 }
  0x45   : > { %1451 = dma.done.wait (%p1557_p4), %s242_s23, 256  }
  0x46   : > { %1453 = vsyncadd (%p1557_p4), %s242_s23, 4294967040 }
  0x47   : > { %1455 = dma.done.wait (%p45_p1), [#allocation5], 16  }
  0x48   : > { %1457 = vsyncadd (%p45_p1), [#allocation5], 4294967280 }
  0x49   : > { %1459 = dma.done.wait (%p45_p1), [#allocation6], 16  }
  0x4a   : > { %1461 = vsyncadd (%p45_p1), [#allocation6], 4294967280 }
  0x4b   : > { %1463 = dma.done.wait (%p45_p1), [#allocation10], 576  }
  0x4c   : > { %1465 = vsyncadd (%p45_p1), [#allocation10], 4294966720 }
  0x4d   : > { %266 = sfence }
  0x4e   : > { %v289_v0 = vlaneseq  ;;  %v1650_v1 = vld [vmem:[%s245_s26] sm:$0xff]  ;;  %v1652_v2 = vld [vmem:[%s245_s26 + $0x8] sm:$0xff]  ;;  %s2318_s24 = smov 1   ;;  %s2316_s29 = smov 127  }
  0x4f   : > { %v354_v3 = vrot.slane %v1650_v1, 7  ;;  %v355_v4 = vrot.slane %v1652_v2, 7  ;;  %433 = vrot.lane.b32.xlu2 %v1650_v1, %s2318_s24  ;;  %v505_v9 = vrot.slane %v1650_v1, 1  ;;  %v506_v10 = vrot.slane %v1652_v2, 1  ;;  %s1711_s11 = sld [smem:[#allocation7 + $0x2]] }
  0x50   : > { %v1658_v5 = vshrl.u32 %v289_v0, 7  ;;  %s1713_s13 = sld [smem:[#allocation7 + $0xb]]  ;;  %v290_v16 = vand.u32 127, %v289_v0 }
  0x51   : > { %s1715_s14 = sld [smem:[#allocation7 + $0x14]] }
  0x52   : > { %vm310_vm0 = vcmp.gt.s32.totalorder %v1658_v5, 0  ;;  %vm356_vm1 = vcmp.lt.s32.totalorder %v1658_v5, 1  ;;  %vm507_vm2 = vcmp.lt.s32.totalorder %v1658_v5, 7  ;;  %v1690_v12 = vadd.s32 8, %v1658_v5  ;;  %s1717_s15 = sld [smem:[#allocation7 + $0x1d]] }
  0x53   : > { %v358_v6 = vsel %vm356_vm1, %v355_v4, %v354_v3  ;;  %v1676_v8 = vsel %vm356_vm1, %v354_v3, %v355_v4  ;;  %v1687_v11 = vsel %vm507_vm2, %v505_v9, %v506_v10  ;;  %v509_v13 = vsel %vm507_vm2, %v506_v10, %v505_v9  ;;  %s1719_s6 = sld [smem:[#allocation7]] }
  0x54   : > { %v1666_v7 = vsel %vm310_vm0, %v358_v6, 0.0  ;;  %vm309_vm3 = vcmp.lt.s32.totalorder %v1690_v12, 15  ;;  %s1721_s7 = sld [smem:[#allocation7 + $0x1]]  ;;  %v295_v17 = vand.u32 15, %v290_v16 }
  0x55   : > { %405 = vrot.lane.b32.xlu1 %v1666_v7, %s2316_s29  ;;  %365 = vrot.lane.b32.xlu0 %v1666_v7, %s2318_s24  ;;  %v1703_v14 = vsel %vm309_vm3, %v509_v13, 0.0  ;;  %s1723_s8 = sld [smem:[#allocation7 + $0x9]]  ;;  %v413_v20 = vstv %s1711_s11 }
  0x56   : > { %s1725_s9 = sld [smem:[#allocation7 + $0xa]]  ;;  %vm1759_vm4 = vcmp.gt.s32.totalorder %v295_v17, 0  ;;  %v418_v21 = vstv %s1713_s13  ;;  %vm1792_vm5 = vcmp.lt.s32.totalorder %v295_v17, 15  ;;  %s2393_s13 = sshll.u32 %s1628_s12, 4 }
  0x57   : > { %435 = vrot.lane.b32.xlu2 %v1652_v2, %s2318_s24  ;;  %s1727_s30 = sld [smem:[#allocation7 + $0x12]]  ;;  %v423_v22 = vstv %s1715_s14 }
  0x58   : > { %s1729_s10 = sld [smem:[#allocation7 + $0x13]]  ;;  %v428_v24 = vstv %s1717_s15  ;;  %s288_s15 = scalar_lea.vmem [#allocation11], %s2393_s13 }
  0x59   : > { %s1731_s23 = sld [smem:[#allocation7 + $0x1b]]  ;;  %v373_v25 = vstv %s1719_s6 }
  0x5a   : > { %s1733_s26 = sld [smem:[#allocation7 + $0x1c]]  ;;  %v385_v23 = vstv %s1721_s7 }
  0x5b   : > { %s1735_s16 = sld [smem:[#allocation7 + $0x3]]  ;;  %v2336_v26 = vstv %s1723_s8  ;;  %v1784_v32 = vmul.f32 %v385_v23, %v1666_v7  ;;  %v1836_v54 = vmul.f32 %v385_v23, %v1676_v8 }
  0x5c   : > { %s1741_s0 = sld [smem:[#allocation7 + $0x1e]]  ;;  %v390_v29 = vstv %s1725_s9 }
  0x5d   : > { %407 = vrot.lane.b32.xlu1 %v1676_v8, %s2316_s29  ;;  %367 = vrot.lane.b32.xlu0 %v1676_v8, %s2318_s24  ;;  %s1743_s1 = sld [smem:[#allocation7 + $0x4]]  ;;  %v2335_v27 = vstv %s1727_s30  ;;  %v1803_v41 = vmul.f32 %v390_v29, %v1666_v7  ;;  %v1839_v55 = vmul.f32 %v390_v29, %v1676_v8 }
  0x5e   : > { %s1745_s2 = sld [smem:[#allocation7 + $0x5]]  ;;  %v395_v30 = vstv %s1729_s10 }
  0x5f   : > { %516 = vrot.lane.b32.xlu2 %v1687_v11, %s2318_s24  ;;  %s1747_s3 = sld [smem:[#allocation7 + $0xd]]  ;;  %v2334_v28 = vstv %s1731_s23  ;;  %v1806_v42 = vmul.f32 %v395_v30, %v1666_v7  ;;  %v1850_v58 = vmul.f32 %v395_v30, %v1676_v8 }
  0x60   : > { %s1749_s27 = sld [smem:[#allocation7 + $0xe]]  ;;  %v400_v31 = vstv %s1733_s26 }
  0x61   : > { %s1751_s20 = sld [smem:[#allocation7 + $0x16]]  ;;  %v439_v34 = vstv %s1735_s16  ;;  %v1813_v45 = vmul.f32 %v400_v31, %v1666_v7  ;;  %v1853_v59 = vmul.f32 %v400_v31, %v1676_v8 }
  0x62   : > { %s1753_s19 = sld [smem:[#allocation7 + $0x17]]  ;;  %v454_v38 = vstv %s1741_s0 }
  0x63   : > { %s1755_s17 = sld [smem:[#allocation7 + $0x1f]]  ;;  %v459_v39 = vstv %s1743_s1 }
  0x64   : > { %s1757_s21 = sld [smem:[#allocation7 + $0x20]]  ;;  %v1828_v51 = vmul.f32 %v459_v39, %v1650_v1  ;;  %v1871_v3 = vmul.f32 %v459_v39, %v1652_v2 }
  0x65   : > { %481 = vrot.lane.b32.xlu1 %v1652_v2, %s2316_s29  ;;  %479 = vrot.lane.b32.xlu0 %v1650_v1, %s2316_s29  ;;  %s1763_s25 = sld [smem:[#allocation7 + $0x6]]  ;;  %v464_v40 = vstv %s1747_s3 }
  0x66   : > { %s1769_s18 = sld [smem:[#allocation7 + $0xf]]  ;;  %v1831_v52 = vmul.f32 %v464_v40, %v1650_v1  ;;  %v1874_v4 = vmul.f32 %v464_v40, %v1652_v2 }
  0x67   : > { %564 = vrot.lane.b32.xlu2 %v1703_v14, %s2316_s29  ;;  %s1775_s28 = sld [smem:[#allocation7 + $0x18]]  ;;  %v469_v43 = vstv %s1751_s20 }
  0x68   : > { %s1781_s5 = sld [smem:[#allocation7 + $0x21]]  ;;  %v1842_v56 = vmul.f32 %v469_v43, %v1650_v1  ;;  %v1877_v6 = vmul.f32 %v469_v43, %v1652_v2 }
  0x69   : > { %s1790_s7 = sld [smem:[#allocation7 + $0x7]]  ;;  %v474_v44 = vstv %s1755_s17 }
  0x6a   : > { %s1800_s9 = sld [smem:[#allocation7 + $0x8]]  ;;  %v1845_v57 = vmul.f32 %v474_v44, %v1650_v1  ;;  %v1880_v7 = vmul.f32 %v474_v44, %v1652_v2 }
  0x6b   : > { %s1810_s16 = sld [smem:[#allocation7 + $0x10]]  ;;  %v2333_v0 = vstv %s1763_s25 }
  0x6c   : > { %s1821_s0 = sld [smem:[#allocation7 + $0x19]]  ;;  %v2332_v9 = vstv %s1769_s18 }
  0x6d   : > { %562 = vrot.lane.b32.xlu1 %v1687_v11, %s2316_s29  ;;  %518 = vrot.lane.b32.xlu0 %v1703_v14, %s2318_s24  ;;  %s1737_s29 = sld [smem:[#allocation7 + $0xc]]  ;;  %v2331_v10 = vstv %s1775_s28 }
  0x6e   : > { %s1739_s24 = sld [smem:[#allocation7 + $0x15]]  ;;  %v2330_v13 = vstv %s1781_s5 }
  0x6f   : > { %s1833_s1 = sld [smem:[#allocation7 + $0x11]]  ;;  %v542_v30 = vstv %s1790_s7 }
  0x70   : > { %s1847_s3 = sld [smem:[#allocation7 + $0x1a]]  ;;  %v568_v8 = vstv %s1800_s9 }
  0x71   : > { %s1859_s20 = sld [smem:[#allocation7 + $0x22]]  ;;  %v547_v31 = vstv %s1810_s16 }
  0x72   : > { %s1868_s17 = sld [smem:[#allocation7 + $0x23]] }
  0x73   : > { %v444_v35 = vstv %s1737_s29  ;;  %s1888_s29 = sld [smem:[#allocation8 + $0x1]] }
  0x74   : > { %v449_v37 = vstv %s1739_s24  ;;  %s1882_s24 = sld [smem:[#allocation8]] }
  0x75   : > { %s1897_s10 = sld [smem:[#allocation8 + $0x2]] }
  0x76   : > { %s1901_s26 = sld [smem:[#allocation8 + $0x3]] }
  0xa9   : > { %v434_v15 = vpop.permute.xlu2 %433 }
  0xaa   : > { %v437_v33 = vsel %vm1759_vm4, %v434_v15, 0.0 }
  0xab   : > { %v1815_v46 = vmul.f32 %v439_v34, %v437_v33  ;;  %v1817_v47 = vmul.f32 %v444_v35, %v437_v33  ;;  %v1823_v49 = vmul.f32 %v449_v37, %v437_v33  ;;  %v1825_v50 = vmul.f32 %v454_v38, %v437_v33 }
  0xac   : > { %v552_v33 = vstv %s1821_s0 }
  0xb1   : > { %v436_v18 = vpop.permute.xlu2 %435 }
  0xb2   : > { %v438_v48 = vsel %vm1759_vm4, %v436_v18, 0.0 }
  0xb3   : > { %v1855_v60 = vmul.f32 %v439_v34, %v438_v48  ;;  %v1857_v61 = vmul.f32 %v444_v35, %v438_v48  ;;  %v1861_v62 = vmul.f32 %v449_v37, %v438_v48  ;;  %v1863_v63 = vmul.f32 %v454_v38, %v438_v48 }
  0xb4   : > { %v1929_v48 = vmul.f32 %v542_v30, %v1687_v11 }
  0xb9   : > { %v517_v53 = vpop.permute.xlu2 %516 }
  0xba   : > { %v520_v1 = vsel %vm1759_vm4, %v517_v53, 0.0  ;;  %v1932_v53 = vmul.f32 %v547_v31, %v1687_v11 }
  0xbb   : > { %v1895_v23 = vmul.f32 %v2333_v0, %v520_v1  ;;  %v1910_v35 = vmul.f32 %v2332_v9, %v520_v1  ;;  %v1914_v37 = vmul.f32 %v2331_v10, %v520_v1  ;;  %v1918_v38 = vmul.f32 %v2330_v13, %v520_v1 }
  0xbc   : > { %v1935_v1 = vmul.f32 %v552_v33, %v1687_v11 }
  0xc7   : > { %v406_v15 = vpop.permute.xlu1 %405  ;;  %v366_v16 = vpop.permute.xlu0 %365 }
  0xc8   : > { %v371_v29 = vsel %vm1759_vm4, %v366_v16, 0.0  ;;  %v411_v34 = vsel %vm1792_vm5, %v406_v15, 0.0  ;;  %v557_v15 = vstv %s1859_s20 }
  0xc9   : > { %v374_v39 = vmul.f32 %v373_v25, %v371_v29  ;;  %v377_v40 = vmul.f32 %v2336_v26, %v371_v29  ;;  %v380_v43 = vmul.f32 %v2335_v27, %v371_v29  ;;  %v383_v44 = vmul.f32 %v2334_v28, %v371_v29 }
  0xca   : > { %v414_v16 = vmul.f32 %v413_v20, %v411_v34  ;;  %v419_v13 = vmul.f32 %v418_v21, %v411_v34  ;;  %v424_v9 = vmul.f32 %v423_v22, %v411_v34  ;;  %v429_v0 = vmul.f32 %v428_v24, %v411_v34 }
  0xcb   : > { %v388_v29 = vadd.f32 %v1784_v32, %v374_v39  ;;  %v393_v10 = vadd.f32 %v1803_v41, %v377_v40  ;;  %v398_v18 = vadd.f32 %v1806_v42, %v380_v43  ;;  %v403_v17 = vadd.f32 %v1813_v45, %v383_v44  ;;  %v565_v41 = vpop.permute.xlu2 %564 }
  0xcc   : > { %v1951_v2 = vmul.f32 %v557_v15, %v1687_v11  ;;  %v603_v40 = vstv %s1901_s26  ;;  %v1962_v43 = vmul.f32 %v542_v30, %v1703_v14  ;;  %v2363_v30 = vstv %s1723_s8  ;;  %s1012_s8 = scalar_lea.sflag [#allocation4], %s1628_s12 }
  0xcd   : > { %v416_v45 = vadd.f32 %v414_v16, %v388_v29  ;;  %v421_v11 = vadd.f32 %v419_v13, %v393_v10  ;;  %v426_v44 = vadd.f32 %v424_v9, %v398_v18  ;;  %v431_v27 = vadd.f32 %v429_v0, %v403_v17 }
  0xce   : > { %v2364_v0 = vstv %s1727_s30  ;;  %v2365_v18 = vstv %s1731_s23  ;;  %v1985_v29 = vmul.f32 %v547_v31, %v1703_v14 }
  0xcf   : > { %v408_v26 = vpop.permute.xlu1 %407  ;;  %v368_v32 = vpop.permute.xlu0 %367  ;;  %v442_v31 = vadd.f32 %v1815_v46, %v416_v45 }
  0xd0   : > { %v412_v28 = vsel %vm1792_vm5, %v408_v26, 0.0  ;;  %v372_v39 = vsel %vm1759_vm4, %v368_v32, 0.0  ;;  %v1988_v32 = vmul.f32 %v552_v33, %v1703_v14  ;;  %v447_v33 = vadd.f32 %v1817_v47, %v421_v11 }
  0xd1   : > { %v415_v34 = vmul.f32 %v413_v20, %v412_v28  ;;  %v420_v42 = vmul.f32 %v418_v21, %v412_v28  ;;  %v425_v16 = vmul.f32 %v423_v22, %v412_v28  ;;  %v430_v10 = vmul.f32 %v428_v24, %v412_v28 }
  0xd2   : > { %v375_v13 = vmul.f32 %v373_v25, %v372_v39  ;;  %v378_v9 = vmul.f32 %v2363_v30, %v372_v39  ;;  %v381_v17 = vmul.f32 %v2364_v0, %v372_v39  ;;  %v384_v26 = vmul.f32 %v2365_v18, %v372_v39 }
  0xd3   : > { %v1991_v20 = vmul.f32 %v557_v15, %v1703_v14  ;;  %v567_v21 = vsel %vm1792_vm5, %v565_v41, 0.0  ;;  %v452_v14 = vadd.f32 %v1823_v49, %v426_v44  ;;  %v457_v15 = vadd.f32 %v1825_v50, %v431_v27 }
  0xd4   : > { %v389_v22 = vadd.f32 %v1836_v54, %v375_v13  ;;  %v394_v24 = vadd.f32 %v1839_v55, %v378_v9  ;;  %v399_v25 = vadd.f32 %v1850_v58, %v381_v17  ;;  %v404_v28 = vadd.f32 %v1853_v59, %v384_v26 }
  0xd5   : > { %v2009_v47 = vmul.f32 %v568_v8, %v567_v21  ;;  %v2366_v27 = vstv %s1833_s1  ;;  %v462_v45 = vadd.f32 %v1828_v51, %v442_v31  ;;  %v467_v11 = vadd.f32 %v1831_v52, %v447_v33 }
  0xd6   : > { %v417_v39 = vadd.f32 %v415_v34, %v389_v22  ;;  %v422_v41 = vadd.f32 %v420_v42, %v394_v24  ;;  %v427_v30 = vadd.f32 %v425_v16, %v399_v25  ;;  %v432_v54 = vadd.f32 %v430_v10, %v404_v28 }
  0xd7   : > { %v482_v13 = vpop.permute.xlu1 %481  ;;  %v480_v55 = vpop.permute.xlu0 %479  ;;  %v2013_v49 = vmul.f32 %v2366_v27, %v567_v21  ;;  %v472_v44 = vadd.f32 %v1842_v56, %v452_v14  ;;  %v477_v16 = vadd.f32 %v1845_v57, %v457_v15  ;;  %v2367_v9 = vstv %s1745_s2  ;;  %s2390_s2 = smov 1  }
  0xd8   : > { %v484_v58 = vsel %vm1792_vm5, %v482_v13, 0.0  ;;  %v483_v46 = vsel %vm1792_vm5, %v480_v55, 0.0  ;;  %v443_v50 = vadd.f32 %v1855_v60, %v417_v39  ;;  %v448_v59 = vadd.f32 %v1857_v61, %v422_v41 }
  0xd9   : > { %v453_v34 = vadd.f32 %v1861_v62, %v427_v30  ;;  %v458_v42 = vadd.f32 %v1863_v63, %v432_v54  ;;  %v487_v61 = vmul.f32 %v2367_v9, %v484_v58  ;;  %v2368_v0 = vstv %s1749_s27 }
  0xda   : > { %v463_v10 = vadd.f32 %v1871_v3, %v443_v50  ;;  %v468_v60 = vadd.f32 %v1874_v4, %v448_v59  ;;  %v492_v62 = vmul.f32 %v2368_v0, %v484_v58  ;;  %v2369_v17 = vmov %v2367_v9 }
  0xdb   : > { %v486_v18 = vmul.f32 %v2369_v17, %v483_v46  ;;  %v2370_v63 = vmov %v2368_v0  ;;  %v2371_v51 = vstv %s1753_s19  ;;  %v2372_v22 = vstv %s1757_s21  ;;  %s1193_s21 = sshll.u32 %s1548_s22, 4  ;;  %s1024_s22 = sshll.u32 %s288_s15, 4  ;;  %s1025_s22 = int_to_ptr.vmem [resolvable:$true] %s1024_s22 }
  0xdc   : > { %v491_v26 = vmul.f32 %v2370_v63, %v483_v46  ;;  %v496_v52 = vmul.f32 %v2371_v51, %v483_v46  ;;  %v501_v56 = vmul.f32 %v2372_v22, %v483_v46  ;;  %v473_v57 = vadd.f32 %v1877_v6, %v453_v34 }
  0xdd   : > { %v478_v3 = vadd.f32 %v1880_v7, %v458_v42  ;;  %v2373_v24 = vmov %v2371_v51  ;;  %v2374_v25 = vmov %v2372_v22  ;;  %v488_v31 = vadd.f32 %v486_v18, %v462_v45 }
  0xde   : > { %v497_v4 = vmul.f32 %v2373_v24, %v484_v58  ;;  %v502_v28 = vmul.f32 %v2374_v25, %v484_v58  ;;  %v493_v33 = vadd.f32 %v491_v26, %v467_v11  ;;  %v498_v14 = vadd.f32 %v496_v52, %v472_v44 }
  0xdf   : > { %v503_v15 = vadd.f32 %v501_v56, %v477_v16  ;;  %v489_v39 = vadd.f32 %v487_v61, %v463_v10  ;;  %v494_v41 = vadd.f32 %v492_v62, %v468_v60  ;;  %v563_v30 = vpop.permute.xlu1 %562  ;;  %v519_v54 = vpop.permute.xlu0 %518  ;;  %v2375_v13 = vstv %s1847_s3 }
  0xe0   : > { %v580_v55 = vmul.f32 %v2375_v13, %v567_v21  ;;  %v2376_v46 = vstv %s1868_s17  ;;  %v525_v7 = vadd.f32 %v1895_v23, %v488_v31  ;;  %v530_v58 = vadd.f32 %v1910_v35, %v493_v33  ;;  %v1279_v33 = vld [vmem:[#allocation9 + $0xc] ss:$0 sm:$0xff] }
  0xe1   : > { %v585_v6 = vmul.f32 %v2376_v46, %v567_v21  ;;  %v535_v27 = vadd.f32 %v1914_v37, %v498_v14  ;;  %v540_v50 = vadd.f32 %v1918_v38, %v503_v15  ;;  %v499_v59 = vadd.f32 %v497_v4, %v473_v57  ;;  %v1280_v14 = vld [vmem:[#allocation9 + $0xd] ss:$0 sm:$0xff]  ;;  %v1281_v15 = vld [vmem:[#allocation9 + $0xe] ss:$0 sm:$0xff] }
  0xe2   : > { %v504_v34 = vadd.f32 %v502_v28, %v478_v3  ;;  %v566_v42 = vsel %vm1792_vm5, %v563_v30, 0.0  ;;  %v521_v21 = vsel %vm1759_vm4, %v519_v54, 0.0  ;;  %v545_v23 = vadd.f32 %v1929_v48, %v525_v7 }
  0xe3   : > { %v550_v45 = vadd.f32 %v1932_v53, %v530_v58  ;;  %v555_v35 = vadd.f32 %v1935_v1, %v535_v27  ;;  %v560_v37 = vadd.f32 %v1951_v2, %v540_v50  ;;  %v569_v11 = vmul.f32 %v568_v8, %v566_v42 }
  0xe4   : > { %v2377_v38 = vstv %s1833_s1  ;;  %v2378_v16 = vmov %v2375_v13  ;;  %v2379_v60 = vmov %v2376_v46  ;;  %v2380_v61 = vstv %s1763_s25  ;;  %v1282_v13 = vld [vmem:[#allocation9 + $0xf] ss:$0 sm:$0xff]  ;;  %v1283_v46 = vld [vmem:[#allocation9 + $0x8] ss:$0 sm:$0xff] }
  0xe5   : > { %v574_v44 = vmul.f32 %v2377_v38, %v566_v42  ;;  %v579_v10 = vmul.f32 %v2378_v16, %v566_v42  ;;  %v584_v9 = vmul.f32 %v2379_v60, %v566_v42  ;;  %v524_v48 = vmul.f32 %v2380_v61, %v521_v21 }
  0xe6   : > { %v2381_v0 = vstv %s1769_s18  ;;  %v2382_v62 = vstv %s1775_s28  ;;  %v2383_v17 = vstv %s1781_s5  ;;  %v571_v18 = vadd.f32 %v569_v11, %v545_v23  ;;  %v1285_v23 = vld [vmem:[#allocation9 + $0xa] ss:$0 sm:$0xff]  ;;  %s2391_s5 = smov 127   ;;  %s2392_s28 = sld [smem:[#allocation29_spill]] }
  0xe7   : > { %v529_v53 = vmul.f32 %v2381_v0, %v521_v21  ;;  %v534_v1 = vmul.f32 %v2382_v62, %v521_v21  ;;  %v539_v2 = vmul.f32 %v2383_v17, %v521_v21  ;;  %v576_v8 = vadd.f32 %v574_v44, %v550_v45  ;;  %v1286_v45 = vld [vmem:[#allocation9 + $0xb] ss:$0 sm:$0xff]  ;;  %v1288_v17 = vld [vmem:[#allocation9 + $0x1] ss:$0 sm:$0xff] }
  0xe8   : > { %v581_v63 = vadd.f32 %v579_v10, %v555_v35  ;;  %v586_v26 = vadd.f32 %v584_v9, %v560_v37  ;;  %v526_v51 = vadd.f32 %v524_v48, %v489_v39  ;;  %v2384_v57 = vstv %s1882_s24  ;;  %v1287_v10 = vld [vmem:[#allocation9] ss:$0 sm:$0xff] }
  0xe9   : > { %v531_v52 = vadd.f32 %v529_v53, %v494_v41  ;;  %v536_v22 = vadd.f32 %v534_v1, %v499_v59  ;;  %v541_v56 = vadd.f32 %v539_v2, %v504_v34  ;;  %v589_v3 = vadd.f32 %v2384_v57, %v571_v18 }
  0xea   : > { %v2385_v24 = vstv %s1888_s29  ;;  %v2386_v25 = vstv %s1897_s10  ;;  %v604_v31 = vadd.f32 %v603_v40, %v586_v26  ;;  %v546_v30 = vadd.f32 %v1962_v43, %v526_v51  ;;  %v1284_v43 = vld [vmem:[#allocation9 + $0x9] ss:$0 sm:$0xff]  ;;  %v1289_v26 = vld [vmem:[#allocation9 + $0x2] ss:$0 sm:$0xff] }
  0xeb   : > { %v594_v4 = vadd.f32 %v2385_v24, %v576_v8  ;;  %v599_v28 = vadd.f32 %v2386_v25, %v581_v63  ;;  %v551_v54 = vadd.f32 %v1985_v29, %v531_v52  ;;  %v556_v39 = vadd.f32 %v1988_v32, %v536_v22 }
  0xec   : > { %v561_v41 = vadd.f32 %v1991_v20, %v541_v56  ;;  %v2087_v7 = vmax.f32 %v589_v3, 0.0  ;;  %v2093_v50 = vmax.f32 %v604_v31, 0.0  ;;  %v572_v29 = vadd.f32 %v2009_v47, %v546_v30  ;;  %s1023_s11 = scalar_lea.hbm %s2392_s28, %s1193_s21  ;;  %s1426_s16 = scalar_lea.hbm %s2392_s28, 32 }
  0xed   : > { %v2089_v58 = vmax.f32 %v594_v4, 0.0  ;;  %v2091_v27 = vmax.f32 %v599_v28, 0.0  ;;  %v577_v32 = vadd.f32 %v2013_v49, %v551_v54  ;;  %v582_v20 = vadd.f32 %v580_v55, %v556_v39  ;;  %s1026_s6 = sshll.u32 %s1023_s11, 4  ;;  %s1027_s6 = int_to_ptr.hbm [resolvable:$true] %s1026_s6 }
  0xee   : > { %v587_v59 = vadd.f32 %v585_v6, %v561_v41  ;;  %v748_v34 = vmul.f32 %v1279_v33, %v2087_v7  ;;  %v2387_v35 = vmov %v2384_v57  ;;  %v2388_v11 = vmov %v2385_v24  ;;  %v1290_v57 = vld [vmem:[#allocation9 + $0x3] ss:$0 sm:$0xff]  ;;  %v1291_v41 = vld [vmem:[#allocation9 + $0x14] ss:$0 sm:$0xff]  ;;  %s1420_s30 = sshra.s32 %s1027_s6, 4  ;;  %s1421_s30 = int_to_ptr.hbm [resolvable:$true] %s1420_s30 }
  0xef   : > { %v755_v42 = vmul.f32 %v1280_v14, %v2089_v58  ;;  %v764_v21 = vmul.f32 %v1281_v15, %v2091_v27  ;;  %v590_v37 = vadd.f32 %v2387_v35, %v572_v29  ;;  %v595_v38 = vadd.f32 %v2388_v11, %v577_v32  ;;  %s1422_s23 = scalar_lea.hbm %s1421_s30, 16  ;;  %p1427_p9 = scmp.lt.s32.totalorder %s1421_s30, %s2392_s28 }
  0xf0   : > { %v2389_v44 = vmov %v2386_v25  ;;  %v605_v47 = vadd.f32 %v603_v40, %v587_v59  ;;  %v773_v55 = vmul.f32 %v1282_v13, %v2093_v50  ;;  %v700_v6 = vmul.f32 %v1283_v46, %v2087_v7  ;;  %v1296_v59 = vld [vmem:[#allocation9 + $0x19] ss:$0 sm:$0xff]  ;;  %p1423_p1 = scmp.ne.s32.totalorder %s1421_s30, %s1422_s23  ;;  %p1428_p10 = scmp.lt.s32.totalorder %s1426_s16, %s1422_s23 }
  0xf1   : > { %v600_v16 = vadd.f32 %v2389_v44, %v582_v20  ;;  %v757_v49 = vadd.f32 %v755_v42, %v748_v34  ;;  %v707_v60 = vmul.f32 %v1284_v43, %v2089_v58  ;;  %v2111_v9 = vmax.f32 %v590_v37, 0.0  ;;  %v1297_v44 = vld [vmem:[#allocation9 + $0x1a] ss:$0 sm:$0xff] }
  0xf2   : > { %v2113_v61 = vmax.f32 %v595_v38, 0.0  ;;  %v2117_v0 = vmax.f32 %v605_v47, 0.0  ;;  %v716_v40 = vmul.f32 %v1285_v23, %v2091_v27  ;;  %v725_v1 = vmul.f32 %v1286_v45, %v2093_v50  ;;  %p1424_p4 = pnand %p1423_p1, %p1600_p7  ;;  %p1429_p2 = por %p1428_p10, %p1427_p9 }
  0xf3   : > { %v2115_v48 = vmax.f32 %v600_v16, 0.0  ;;  %v766_v53 = vadd.f32 %v764_v21, %v757_v49  ;;  %v709_v62 = vadd.f32 %v707_v60, %v700_v6  ;;  %v749_v2 = vmul.f32 %v1279_v33, %v2111_v9 }
  0xf4   : > { %v756_v18 = vmul.f32 %v1280_v14, %v2113_v61  ;;  %v612_v63 = vmul.f32 %v1287_v10, %v2087_v7  ;;  %v774_v52 = vmul.f32 %v1282_v13, %v2117_v0  ;;  %v701_v22 = vmul.f32 %v1283_v46, %v2111_v9  ;;  %v1292_v13 = vld [vmem:[#allocation9 + $0x15] ss:$0 sm:$0xff]  ;;  %v1295_v46 = vld [vmem:[#allocation9 + $0x18] ss:$0 sm:$0xff]  ;;  %p1425_p8 = pneg %p1424_p4 }
  0xf5   : > { %v765_v8 = vmul.f32 %v1281_v15, %v2115_v48  ;;  %v775_v51 = vadd.f32 %v773_v55, %v766_v53  ;;  %v708_v56 = vmul.f32 %v1284_v43, %v2113_v61  ;;  %v717_v24 = vmul.f32 %v1285_v23, %v2115_v48 }
  0xf6   : > { %v758_v3 = vadd.f32 %v756_v18, %v749_v2  ;;  %v718_v4 = vadd.f32 %v716_v40, %v709_v62  ;;  %v613_v25 = vmul.f32 %v1287_v10, %v2111_v9  ;;  %v726_v31 = vmul.f32 %v1286_v45, %v2117_v0  ;;  %v1293_v45 = vld [vmem:[#allocation9 + $0x16] ss:$0 sm:$0xff]  ;;  %v1298_v62 = vld [vmem:[#allocation9 + $0x1b] ss:$0 sm:$0xff]  ;;  %p1430_p11 = pnand %p1429_p2, %p1425_p8 }
  0xf7   : > { %777 = vrot.lane.b32.xlu1 %v775_v51, %s2390_s2  ;;  %v710_v28 = vadd.f32 %v708_v56, %v701_v22  ;;  %v619_v33 = vmul.f32 %v1288_v17, %v2089_v58  ;;  %v620_v14 = vmul.f32 %v1288_v17, %v2113_v61  ;;  %v628_v54 = vmul.f32 %v1289_v26, %v2091_v27 }
  0xf8   : > { %v767_v15 = vadd.f32 %v765_v8, %v758_v3  ;;  %v727_v30 = vadd.f32 %v725_v1, %v718_v4  ;;  %v629_v39 = vmul.f32 %v1289_v26, %v2115_v48  ;;  %v637_v20 = vmul.f32 %v1290_v57, %v2093_v50  ;;  %v1294_v8 = vld [vmem:[#allocation9 + $0x17] ss:$0 sm:$0xff]  ;;  %v1299_v26 = vld [vmem:[#allocation9 + $0x20] ss:$0 sm:$0xff] }
  0xf9   : > { %v719_v43 = vadd.f32 %v717_v24, %v710_v28  ;;  %v621_v29 = vadd.f32 %v619_v33, %v612_v63  ;;  %v622_v32 = vadd.f32 %v620_v14, %v613_v25  ;;  %v638_v42 = vmul.f32 %v1290_v57, %v2117_v0  ;;  %v1300_v57 = vld [vmem:[#allocation9 + $0x21] ss:$0 sm:$0xff] }
  0xfa   : > { %v776_v34 = vadd.f32 %v774_v52, %v767_v15  ;;  %v827_v21 = vmul.f32 %v1291_v41, %v2111_v9  ;;  %v834_v23 = vmul.f32 %v1292_v13, %v2113_v61  ;;  %v729_v37 = vrot.slane %v727_v30, 7  ;;  %v1301_v15 = vld [vmem:[#allocation9 + $0x22] ss:$0 sm:$0xff] }
  0xfb   : > { %v728_v35 = vadd.f32 %v726_v31, %v719_v43  ;;  %v630_v11 = vadd.f32 %v628_v54, %v621_v29  ;;  %v631_v38 = vadd.f32 %v629_v39, %v622_v32  ;;  %v843_v47 = vmul.f32 %v1293_v45, %v2115_v48  ;;  %v1303_v43 = vld [vmem:[#allocation9 + $0x4] ss:$0 sm:$0xff] }
  0xfc   : > { %779 = vrot.lane.b32.xlu2 %v776_v34, %s2390_s2  ;;  %v836_v16 = vadd.f32 %v834_v23, %v827_v21  ;;  %v868_v10 = vmul.f32 %v1295_v46, %v2087_v7  ;;  %v869_v49 = vmul.f32 %v1295_v46, %v2111_v9  ;;  %v875_v53 = vmul.f32 %v1296_v59, %v2089_v58  ;;  %v1304_v23 = vld [vmem:[#allocation9 + $0x5] ss:$0 sm:$0xff] }
  0xfd   : > { %v730_v55 = vrot.slane %v728_v35, 7  ;;  %v639_v6 = vadd.f32 %v637_v20, %v630_v11  ;;  %v640_v60 = vadd.f32 %v638_v42, %v631_v38  ;;  %v876_v1 = vmul.f32 %v1296_v59, %v2113_v61  ;;  %v1302_v59 = vld [vmem:[#allocation9 + $0x23] ss:$0 sm:$0xff] }
  0xfe   : > { %v845_v40 = vadd.f32 %v843_v47, %v836_v16  ;;  %v884_v63 = vmul.f32 %v1297_v44, %v2091_v27  ;;  %v877_v52 = vadd.f32 %v875_v53, %v868_v10  ;;  %v885_v56 = vmul.f32 %v1297_v44, %v2115_v48  ;;  %v1305_v44 = vld [vmem:[#allocation9 + $0x6] ss:$0 sm:$0xff] }
  0xff   : > { %v731_v17 = vsel %vm356_vm1, %v729_v37, %v730_v55  ;;  %v641_v2 = vrot.slane %v639_v6, 7  ;;  %v642_v18 = vrot.slane %v640_v60, 7  ;;  %v732_v51 = vsel %vm356_vm1, %v730_v55, %v729_v37  ;;  %v1306_v55 = vld [vmem:[#allocation9 + $0x7] ss:$0 sm:$0xff] }
 0x100   : > { %737 = vrot.lane.b32.xlu0 %v731_v17, %s2391_s5  ;;  %v878_v22 = vadd.f32 %v876_v1, %v869_v49  ;;  %v852_v4 = vmul.f32 %v1294_v8, %v2117_v0  ;;  %v893_v25 = vmul.f32 %v1298_v62, %v2093_v50  ;;  %v886_v28 = vadd.f32 %v884_v63, %v877_v52 }
 0x101   : > { %v643_v3 = vsel %vm356_vm1, %v641_v2, %v642_v18  ;;  %v644_v24 = vsel %vm356_vm1, %v642_v18, %v641_v2  ;;  %v894_v33 = vmul.f32 %v1298_v62, %v2117_v0  ;;  %v826_v14 = vmul.f32 %v1291_v41, %v2087_v7 }
 0x102   : > { %649 = vrot.lane.b32.xlu1 %v643_v3, %s2390_s2  ;;  %v887_v31 = vadd.f32 %v885_v56, %v878_v22  ;;  %v733_v30 = vsel %vm310_vm0, %v732_v51, 0.0  ;;  %v854_v54 = vadd.f32 %v852_v4, %v845_v40  ;;  %v833_v39 = vmul.f32 %v1292_v13, %v2089_v58  ;;  %v1308_v51 = vld [vmem:[#allocation9 + $0x11] ss:$0 sm:$0xff]  ;;  %v1309_v3 = vld [vmem:[#allocation9 + $0x12] ss:$0 sm:$0xff] }
 0x103   : > { %v958_v46 = vmul.f32 %v1299_v26, %v2087_v7  ;;  %v2167_v29 = vadd.f32 %v893_v25, %v886_v28  ;;  %v959_v20 = vmul.f32 %v1299_v26, %v2111_v9  ;;  %v965_v41 = vmul.f32 %v1300_v57, %v2089_v58  ;;  %v1307_v26 = vld [vmem:[#allocation9 + $0x10] ss:$0 sm:$0xff] }
 0x104   : > { %735 = vrot.lane.b32.xlu2 %v733_v30, %s2391_s5  ;;  %v2169_v32 = vadd.f32 %v894_v33, %v887_v31  ;;  %v645_v34 = vsel %vm310_vm0, %v644_v24, 0.0  ;;  %v835_v42 = vadd.f32 %v833_v39, %v826_v14  ;;  %v842_v13 = vmul.f32 %v1293_v45, %v2091_v27  ;;  %v1310_v30 = vld [vmem:[#allocation9 + $0x13] ss:$0 sm:$0xff] }
 0x105   : > { %v966_v21 = vmul.f32 %v1300_v57, %v2113_v61  ;;  %v967_v37 = vadd.f32 %v965_v41, %v958_v46  ;;  %v974_v11 = vmul.f32 %v1301_v15, %v2091_v27  ;;  %v975_v38 = vmul.f32 %v1301_v15, %v2115_v48  ;;  %v1312_v41 = vld [vmem:[#allocation9 + $0x1d] ss:$0 sm:$0xff] }
 0x106   : > { %v898_v35 = vrot.slane %v2169_v32, 1  ;;  %v897_v16 = vrot.slane %v2167_v29, 1  ;;  %v844_v47 = vadd.f32 %v842_v13, %v835_v42  ;;  %v658_v49 = vmul.f32 %v1303_v43, %v2087_v7 }
 0x107   : > { %v968_v10 = vadd.f32 %v966_v21, %v959_v20  ;;  %v851_v45 = vmul.f32 %v1294_v8, %v2093_v50  ;;  %v976_v6 = vadd.f32 %v974_v11, %v967_v37  ;;  %v983_v60 = vmul.f32 %v1302_v59, %v2093_v50  ;;  %v1313_v21 = vld [vmem:[#allocation9 + $0x1e] ss:$0 sm:$0xff] }
 0x108   : > { %647 = vrot.lane.b32.xlu0 %v645_v34, %s2390_s2  ;;  %v659_v53 = vmul.f32 %v1303_v43, %v2111_v9  ;;  %v899_v62 = vsel %vm507_vm2, %v897_v16, %v898_v35  ;;  %v984_v1 = vmul.f32 %v1302_v59, %v2117_v0  ;;  %v665_v17 = vmul.f32 %v1304_v23, %v2089_v58 }
 0x109   : > { %v977_v40 = vadd.f32 %v975_v38, %v968_v10  ;;  %v853_v2 = vadd.f32 %v851_v45, %v844_v47  ;;  %v985_v18 = vadd.f32 %v983_v60, %v976_v6  ;;  %v666_v8 = vmul.f32 %v1304_v23, %v2113_v61 }
 0x10a   : > { %857 = vrot.lane.b32.xlu1 %v854_v54, %s2391_s5  ;;  %v674_v63 = vmul.f32 %v1305_v44, %v2091_v27  ;;  %v667_v22 = vadd.f32 %v665_v17, %v658_v49  ;;  %v675_v56 = vmul.f32 %v1305_v44, %v2115_v48  ;;  %v683_v57 = vmul.f32 %v1306_v55, %v2093_v50  ;;  %v1311_v54 = vld [vmem:[#allocation9 + $0x1c] ss:$0 sm:$0xff] }
 0x10b   : > { %v986_v52 = vadd.f32 %v984_v1, %v977_v40  ;;  %v668_v24 = vadd.f32 %v666_v8, %v659_v53  ;;  %v684_v4 = vmul.f32 %v1306_v55, %v2117_v0  ;;  %v791_v25 = vmul.f32 %v1307_v26, %v2111_v9  ;;  %v1314_v53 = vld [vmem:[#allocation9 + $0x1f] ss:$0 sm:$0xff] }
 0x10c   : > { %903 = vrot.lane.b32.xlu2 %v899_v62, %s2390_s2  ;;  %v798_v28 = vmul.f32 %v1308_v51, %v2113_v61  ;;  %v987_v31 = vrot.slane %v985_v18, 1  ;;  %v676_v14 = vadd.f32 %v674_v63, %v667_v22  ;;  %v807_v15 = vmul.f32 %v1309_v3, %v2115_v48 }
 0x10d   : > { %v988_v33 = vrot.slane %v986_v52, 1  ;;  %v677_v39 = vadd.f32 %v675_v56, %v668_v24  ;;  %v790_v43 = vmul.f32 %v1307_v26, %v2087_v7  ;;  %v797_v20 = vmul.f32 %v1308_v51, %v2089_v58 }
 0x10e   : > { %v800_v46 = vadd.f32 %v798_v28, %v791_v25  ;;  %v685_v42 = vadd.f32 %v683_v57, %v676_v14  ;;  %v816_v13 = vmul.f32 %v1310_v30, %v2117_v0  ;;  %v806_v38 = vmul.f32 %v1309_v3, %v2091_v27 }
 0x10f   : > { %v989_v59 = vsel %vm507_vm2, %v987_v31, %v988_v33  ;;  %v990_v34 = vsel %vm507_vm2, %v988_v33, %v987_v31  ;;  %v686_v23 = vadd.f32 %v684_v4, %v677_v39  ;;  %v799_v11 = vadd.f32 %v797_v20, %v790_v43 }
 0x110   : > { %855 = vrot.lane.b32.xlu0 %v853_v2, %s2391_s5  ;;  %v809_v37 = vadd.f32 %v807_v15, %v800_v46  ;;  %v687_v44 = vrot.slane %v685_v42, 7  ;;  %v815_v47 = vmul.f32 %v1310_v30, %v2093_v50  ;;  %v916_v10 = vmul.f32 %v1311_v54, %v2087_v7 }
 0x111   : > { %v917_v49 = vmul.f32 %v1311_v54, %v2111_v9  ;;  %v688_v55 = vrot.slane %v686_v23, 7  ;;  %v808_v6 = vadd.f32 %v806_v38, %v799_v11  ;;  %v923_v60 = vmul.f32 %v1312_v41, %v2089_v58 }
 0x112   : > { %993 = vrot.lane.b32.xlu1 %v989_v59, %s2391_s5  ;;  %v818_v45 = vadd.f32 %v816_v13, %v809_v37  ;;  %v992_v62 = vsel %vm309_vm3, %v990_v34, 0.0  ;;  %v900_v7 = vsel %vm507_vm2, %v898_v35, %v897_v16  ;;  %v924_v9 = vmul.f32 %v1312_v41, %v2113_v61 }
 0x113   : > { %v932_v40 = vmul.f32 %v1313_v21, %v2091_v27  ;;  %v689_v58 = vsel %vm356_vm1, %v687_v44, %v688_v55  ;;  %v690_v1 = vsel %vm356_vm1, %v688_v55, %v687_v44  ;;  %v817_v17 = vadd.f32 %v815_v47, %v808_v6  ;;  %v1315_v44 = vld [vmem:[%s2313_s4] ss:$0 sm:$0xff] }
 0x114   : > { %995 = vrot.lane.b32.xlu2 %v992_v62, %s2391_s5  ;;  %v925_v2 = vadd.f32 %v923_v60, %v916_v10  ;;  %v926_v29 = vadd.f32 %v924_v9, %v917_v49  ;;  %v933_v32 = vmul.f32 %v1313_v21, %v2115_v48  ;;  %v941_v35 = vmul.f32 %v1314_v53, %v2093_v50 }
 0x115   : > { %v902_v61 = vsel %vm309_vm3, %v900_v7, 0.0  ;;  %v942_v16 = vmul.f32 %v1314_v53, %v2117_v0  ;;  %v691_v14 = vsel %vm310_vm0, %v690_v1, 0.0 }
 0x116   : > { %v934_v18 = vadd.f32 %v932_v40, %v925_v2  ;;  %v935_v27 = vadd.f32 %v933_v32, %v926_v29 }
 0x118   : > { %905 = vrot.lane.b32.xlu0 %v902_v61, %s2390_s2  ;;  %v943_v8 = vadd.f32 %v941_v35, %v934_v18  ;;  %v944_v63 = vadd.f32 %v942_v16, %v935_v27 }
 0x11a   : > { %v945_v26 = vrot.slane %v943_v8, 1  ;;  %v946_v51 = vrot.slane %v944_v63, 1 }
 0x11c   : > { %v947_v52 = vsel %vm507_vm2, %v945_v26, %v946_v51  ;;  %v948_v48 = vsel %vm507_vm2, %v946_v51, %v945_v26 }
 0x11d   : > { %v950_v62 = vsel %vm309_vm3, %v948_v48, 0.0 }
 0x156   : > { %v780_v50 = vpop.permute.xlu2 %779 }
 0x157   : > { %v782_v28 = vsel %vm1759_vm4, %v780_v50, 0.0 }
 0x15e   : > { %v736_v4 = vpop.permute.xlu2 %735 }
 0x15f   : > { %v739_v46 = vsel %vm1792_vm5, %v736_v4, 0.0 }
 0x166   : > { %v904_v59 = vpop.permute.xlu2 %903 }
 0x167   : > { %v907_v21 = vsel %vm1759_vm4, %v904_v59, 0.0 }
 0x169   : > { %v778_v22 = vpop.permute.xlu1 %777 }
 0x16a   : > { %v781_v20 = vsel %vm1759_vm4, %v778_v22, 0.0 }
 0x16e   : > { %v996_v6 = vpop.permute.xlu2 %995 }
 0x16f   : > { %v998_v40 = vsel %vm1792_vm5, %v996_v6, 0.0 }
 0x172   : > { %v738_v56 = vpop.permute.xlu0 %737 }
 0x173   : > { %v740_v24 = vsel %vm1792_vm5, %v738_v56, 0.0 }
 0x174   : > { %v650_v57 = vpop.permute.xlu1 %649 }
 0x175   : > { %v652_v3 = vsel %vm1759_vm4, %v650_v57, 0.0 }
 0x176   : > { %v694_v0 = vadd.f32 %v689_v58, %v652_v3 }
 0x178   : > { %v742_v25 = vadd.f32 %v740_v24, %v694_v0 }
 0x17a   : > { %v648_v31 = vpop.permute.xlu0 %647  ;;  %v784_v33 = vadd.f32 %v782_v28, %v742_v25 }
 0x17b   : > { %v651_v15 = vsel %vm1759_vm4, %v648_v31, 0.0 }
 0x17c   : > { %v693_v30 = vadd.f32 %v691_v14, %v651_v15  ;;  %v820_v54 = vadd.f32 %v818_v45, %v784_v33  ;;  %v858_v39 = vpop.permute.xlu1 %857 }
 0x17d   : > { %v860_v11 = vsel %vm1792_vm5, %v858_v39, 0.0 }
 0x17e   : > { %v741_v43 = vadd.f32 %v739_v46, %v693_v30  ;;  %v862_v10 = vadd.f32 %v860_v11, %v820_v54 }
 0x180   : > { %v783_v41 = vadd.f32 %v781_v20, %v741_v43 }
 0x182   : > { %v819_v34 = vadd.f32 %v817_v17, %v783_v41  ;;  %v856_v42 = vpop.permute.xlu0 %855 }
 0x183   : > { %v859_v5 = vsel %vm1792_vm5, %v856_v42, 0.0 }
 0x184   : > { %v861_v13 = vadd.f32 %v859_v5, %v819_v34  ;;  %v994_v37 = vpop.permute.xlu1 %993 }
 0x185   : > { %v997_v47 = vsel %vm1792_vm5, %v994_v37, 0.0 }
 0x186   : > { %v909_v23 = vadd.f32 %v907_v21, %v861_v13 }
 0x188   : > { %v951_v38 = vadd.f32 %v947_v52, %v909_v23 }
 0x18a   : > { %v999_v49 = vadd.f32 %v997_v47, %v951_v38  ;;  %v906_v55 = vpop.permute.xlu0 %905 }
 0x18b   : > { %v908_v45 = vsel %vm1759_vm4, %v906_v55, 0.0 }
 0x18c   : > { %v1005_v60 = vadd.f32 %v1315_v44, %v999_v49  ;;  %v910_v53 = vadd.f32 %v908_v45, %v862_v10 }
 0x18e   : > { %v1007_v7 = vmax.f32 %v1005_v60, 0.0  ;;  %v952_v9 = vadd.f32 %v950_v62, %v910_v53 }
 0x190   : > { %1009 = vst [vmem:[%s288_s15] sm:$0xff] %v1007_v7  ;;  %v1000_v19 = vadd.f32 %v998_v40, %v952_v9 }
 0x192   : > { %v1006_v12 = vadd.f32 %v1315_v44, %v1000_v19 }
 0x194   : > { %v1008_v58 = vmax.f32 %v1006_v12, 0.0 }
 0x196   : > { %1010 = vst [vmem:[%s288_s15 + $0x8] sm:$0xff] %v1008_v58 }
 0x197   : > { %1433 = shalt.err (!%p1430_p11)
}
 0x198   : > { %s1495_s12 = smov 128   ;;  %s1496_s3 = smov 8  }
 0x199   : > { %1208 = dma.vmem_to_hbm [thread:$0]  (%p1600_p7), %s1025_s22, 256, %s1027_s6, %s1012_s8, %s1495_s12, %s1495_s12, %s1496_s3  }
 0x19a PF: > { %s2395_s20 = sld [smem:[#allocation17_spill]] }
 0x19b   : > { %s2397_s24 = sld [smem:[#allocation20_spill]] }
 0x1a0   : > { %s1041_s29 = sand.u32 1, %s2395_s20  }
 0x1a1   : > { %p2398_p12 = scmp.ge.s32.totalorder %s2397_s24, 2  ;;  %s1042_s10 = scalar_lea.sflag [#allocation4], %s1041_s29 }
 0x1a3   : > { %p1225_p13 = pnand %p2398_p12, %p1562_p6 }
 0x1a5   : > { %p1226_p0 = pneg %p1225_p13 }
 0x1a7   : > { %1467 = dma.done.wait (%p1226_p0), %s1042_s10, 256  }
 0x1a8   : > { %1469 = vsyncadd (%p1226_p0), %s1042_s10, 4294967040  ;;  %s2399_s21 = sld [smem:[#allocation22_spill]] }
 0x1a9   : > { %s2400_s18 = sld [smem:[#allocation18_spill]] }
 0x1aa   : > { %s2401_s19 = sld [smem:[#allocation19_spill]] }
 0x1ab   : > { %s2402_s20 = sld [smem:[#allocation23_spill]] }
 0x1ae   : > { %p21_p3 = scmp.ge.s32.totalorder %s2399_s21, 4  }
 0x1b0   :  { %23 = sbr.rel (!%p21_p3) target bundleno = 14 (0xe), region = 134 }
 0x1b5   :  { %1048 = vsyncpa [#allocation3], 1 }
 0x1b6   :  { %1050 = vsyncpa [#allocation3 + $0x1], 1 }
 0x1b7   :  { %1051 = vsyncpa [#allocation10], 1 }
 0x1b8   :  { %1052 = vsyncpa [#allocation4], 1 }
 0x1b9   :  { %1054 = vsyncpa [#allocation4 + $0x1], 1 }
 0x1ba   :  { %1055 = vsyncpa [#allocation5], 1 }
 0x1bb   :  { %1057 = vsyncpa [#allocation5 + $0x1], 1 }
 0x1bc   :  { %1058 = vsyncpa [#allocation6], 1 }
 0x1bd   :  { %1060 = vsyncpa [#allocation6 + $0x1], 1 }

</bundles_post_ra>
